<compile_context>
chip_gen: v5e
topology: v5e:2x2
jax: 0.10.0
libtpu: 0.0.40
codegen_flags: <defaults>
</compile_context>

<pallas_src>
import jax
import jax.numpy as jnp
import numpy as np
from jax.experimental import pallas as pl
from jax.experimental.pallas import tpu as pltpu

K = 5            # conv kernel size
C1 = 32          # conv1 out channels
C2 = 64          # conv2 out channels
FC1, FC2, FC3 = 512, 256, 128
NTAP = K + 3     # taps per pooled position: s = q + k, q in [0,4), k in [0,5)

_HI = jax.lax.Precision.HIGHEST   # reference only


def _prelu(v, a):
    return jnp.where(v >= 0.0, v, a * v)


def _dot(a, b):
    # DEFAULT matmul precision (single bf16 MXU pass, f32 accumulation).
    return jnp.dot(a, b, preferred_element_type=jnp.float32)


# ------------------------------ Fused kernel --------------------------------


def _make_kernel(B, P1pad, L2, P2):
    """Kernel closed over the static geometry (all Python ints)."""

    def kernel(alphas_ref, taps_ref, w1_ref, b1_ref, w2_ref, b2_ref,
               wf1_hbm, bf1_ref, wf2_hbm, bf2_ref, wf3_ref, bf3_ref,
               wf4_ref, bf4_ref, out_ref,
               wf1_v, wf2_v, dma_sem, p2_scr):
        # -- Kick off the FC1/FC2 weight DMA (~1.5 MiB) so it streams in
        #    behind the conv stage instead of sitting on the critical path. --
        cp1 = pltpu.make_async_copy(wf1_hbm, wf1_v, dma_sem.at[0])
        cp2 = pltpu.make_async_copy(wf2_hbm, wf2_v, dma_sem.at[1])
        cp1.start()
        cp2.start()

        a1 = alphas_ref[0]
        a2 = alphas_ref[1]
        a3 = alphas_ref[2]
        a4 = alphas_ref[3]
        a5 = alphas_ref[4]

        # ---- Conv1d(1,32,k=5) + PReLU + MaxPool1d(4,4): ONE MXU matmul ----
        # taps[b*P1pad + p, s] = x[b, 4p + s]; the block-shifted weight puts
        # pooling phase q in column block q, so pool1 = max over 4 lane blocks.
        y1 = _dot(taps_ref[...], w1_ref[...])                 # (B*P1pad, 4*C1)
        h1 = _prelu(y1 + b1_ref[...], a1)
        p1 = jnp.maximum(
            jnp.maximum(h1[:, 0:C1], h1[:, C1:2 * C1]),
            jnp.maximum(h1[:, 2 * C1:3 * C1], h1[:, 3 * C1:4 * C1]))
        p1r = p1.reshape(B, P1pad, C1)                        # (B, P1pad, C1)

        # ---- Conv1d(32,64,k=5) + PReLU: 5 tap matmuls batched over B ----
        acc2 = _dot(p1r[:, 0:L2, :].reshape(B * L2, C1), w2_ref[0])
        for k in range(1, K):
            acc2 = acc2 + _dot(p1r[:, k:k + L2, :].reshape(B * L2, C1),
                               w2_ref[k])                     # (B*L2, C2)
        h2 = _prelu(acc2 + b2_ref[...], a2).reshape(B, L2, C2)

        # ---- MaxPool1d(4,4) -> lane-dense (B, P2*C2) scratch ----
        # PyTorch's channel-major flatten is folded into wf1 at prep time
        # (row order t*C2 + c), so this scratch IS the flattened FC1 input.
        for t in range(P2):
            p2_scr[:, t * C2:(t + 1) * C2] = jnp.max(
                h2[:, 4 * t:4 * t + 4, :], axis=1)            # (B, C2)

        # ---- MLP head: one matmul per layer, weights already in flight ----
        cp1.wait()
        f = _prelu(_dot(p2_scr[...], wf1_v[...]) + bf1_ref[...], a3)   # (B,512)
        cp2.wait()
        f = _prelu(_dot(f, wf2_v[...]) + bf2_ref[...], a4)             # (B,256)
        f = _prelu(_dot(f, wf3_ref[...]) + bf3_ref[...], a5)           # (B,128)
        out_ref[...] = _dot(f, wf4_ref[...]) + bf4_ref[...]            # (B,out)

    return kernel


# ------------------------------ Wrappers -------------------------------------


def prepare_kernel_params(params):
    """One-time re-layout of PyTorch-shaped parameters into kernel layout."""
    w1 = jnp.asarray(params["w1"], jnp.float32)        # (C1, 1, K)
    w2 = jnp.asarray(params["w2"], jnp.float32)        # (C2, C1, K)
    wfc1 = jnp.asarray(params["wfc1"], jnp.float32)    # (512, C2*P2)
    fc_in = wfc1.shape[1]
    P2 = fc_in // C2
    if fc_in != C2 * P2:
        raise ValueError("FC1 in_features must be a multiple of 64")

    # Block-shifted conv1 weight: column block q holds conv phase q of the pool.
    w1_kc = jnp.transpose(w1[:, 0, :], (1, 0))                    # (K, C1)
    w1blk = jnp.zeros((NTAP, 4, C1), jnp.float32)
    for q in range(4):
        w1blk = w1blk.at[q:q + K, q, :].set(w1_kc)
    w1blk = w1blk.reshape(NTAP, 4 * C1)                           # (8, 128)
    b1blk = jnp.tile(jnp.asarray(params["b1"]).reshape(1, C1), (1, 4))

    # Fold channel-major flatten (flat index = c*P2 + t) into FC1:
    # wf1[t*C2 + c, o] = wfc1[o, c*P2 + t]  -> single (512, 512) weight.
    wf1 = jnp.transpose(wfc1.reshape(FC1, C2, P2), (2, 1, 0)).reshape(P2 * C2,
                                                                      FC1)
    kp = dict(
        alphas=jnp.stack([params["a1"], params["a2"], params["a3"],
                          params["a4"], params["a5"]]),
        w1blk=w1blk, b1blk=b1blk,
        w2=jnp.transpose(w2, (2, 1, 0)),                          # (K, C1, C2)
        b2=params["b2"].reshape(1, C2),
        wf1=wf1, bf1=params["bfc1"].reshape(1, FC1),
        wf2=params["wfc2"].T, bf2=params["bfc2"].reshape(1, FC2),
        wf3=params["wfc3"].T, bf3=params["bfc3"].reshape(1, FC3),
        wf4=params["wfc4"].T, bf4=params["bfc4"].reshape(1, -1),
    )
    return jax.tree_util.tree_map(lambda a: jnp.asarray(a, jnp.float32), kp)


@jax.jit
def convo1dnet_forward(x, kp):
    """x: (B, L) float32 -- equivalent to PyTorch forward(x) (which unsqueezes)."""
    B, L = x.shape
    L1 = L - K + 1            # conv1 output length
    P1 = L1 // 4              # pool1 output length (floor, as in MaxPool1d)
    L2 = P1 - K + 1           # conv2 output length
    P2 = L2 // 4              # pool2 output length
    out_dim = kp["wf4"].shape[1]
    if kp["wf1"].shape[0] != P2 * C2:
        raise ValueError(
            f"FC1 weight expects in_features={kp['wf1'].shape[0]} but input "
            f"length {L} gives {P2 * C2} (LazyLinear materialized for another L)")

    # Layout-only prep (tiny XLA glue fused by jit): tap matrix for the fused
    # conv1+pool1 matmul.  taps[b, p, s] = x[b, 4p + s] for p < P1; padded rows
    # (p >= P1) are zero and their conv outputs are never read downstream.
    P1pad = 8 * ((P1 + 7) // 8)                 # sublane-aligned rows per batch
    n_grp = max(P1pad + 1, (L + 3) // 4)
    xp = jnp.pad(x.astype(jnp.float32), ((0, 0), (0, 4 * n_grp - L)))
    xr = xp.reshape(B, n_grp, 4)
    taps = jnp.concatenate([xr[:, :P1pad, :], xr[:, 1:P1pad + 1, :]], axis=-1)
    taps = taps.reshape(B * P1pad, NTAP)

    vmem = pl.BlockSpec(memory_space=pltpu.MemorySpace.VMEM)
    smem = pl.BlockSpec(memory_space=pltpu.MemorySpace.SMEM)
    hbm = pl.BlockSpec(memory_space=pl.ANY)     # FC1/FC2 weights: manual DMA

    flops = 2 * (B * P1pad * NTAP * 4 * C1                     # conv1 (4 phases)
                 + B * L2 * K * C1 * C2                        # conv2
                 + B * (P2 * C2 * FC1 + FC1 * FC2 + FC2 * FC3 + FC3 * out_dim))
    nbytes = 4 * (taps.size + sum(int(np.prod(v.shape)) for v in kp.values())
                  + B * out_dim)

    return pl.pallas_call(
        _make_kernel(B, P1pad, L2, P2),
        out_shape=jax.ShapeDtypeStruct((B, out_dim), jnp.float32),
        in_specs=[smem, vmem, vmem, vmem, vmem, vmem,
                  hbm, vmem, hbm, vmem, vmem, vmem, vmem, vmem],
        out_specs=vmem,
        scratch_shapes=[
            pltpu.VMEM((P2 * C2, FC1), jnp.float32),   # FC1 weight landing pad
            pltpu.VMEM((FC1, FC2), jnp.float32),       # FC2 weight landing pad
            pltpu.SemaphoreType.DMA((2,)),
            pltpu.VMEM((B, P2 * C2), jnp.float32),     # flattened pool2 output
        ],
        cost_estimate=pl.CostEstimate(flops=flops, transcendentals=0,
                                      bytes_accessed=nbytes),
    )(kp["alphas"], taps, kp["w1blk"], kp["b1blk"], kp["w2"], kp["b2"],
      kp["wf1"], kp["bf1"], kp["wf2"], kp["bf2"], kp["wf3"], kp["bf3"],
      kp["wf4"], kp["bf4"])


# ------------------------- Deterministic parameters --------------------------


def init_params(key, out_dim=10, fc_in=512):
    ks = jax.random.split(key, 12)

    def n(k, shape, scale):
        return (scale * jax.random.normal(k, shape)).astype(jnp.float32)

    return dict(
        # PyTorch parameter shapes: Conv1d weight (out, in, k), Linear (out, in)
        w1=n(ks[0], (C1, 1, K), 0.30),   b1=n(ks[1], (C1,), 0.10),
        w2=n(ks[2], (C2, C1, K), 0.08),  b2=n(ks[3], (C2,), 0.05),
        wfc1=n(ks[4], (FC1, fc_in), 0.04), bfc1=n(ks[5], (FC1,), 0.02),
        wfc2=n(ks[6], (FC2, FC1), 0.04),   bfc2=n(ks[7], (FC2,), 0.02),
        wfc3=n(ks[8], (FC3, FC2), 0.06),   bfc3=n(ks[9], (FC3,), 0.02),
        wfc4=n(ks[10], (out_dim, FC3), 0.09), bfc4=n(ks[11], (out_dim,), 0.02),
        # PReLU default init (num_parameters=1, a=0.25) for the 5 PReLUs
        a1=jnp.float32(0.25), a2=jnp.float32(0.25), a3=jnp.float32(0.25),
        a4=jnp.float32(0.25), a5=jnp.float32(0.25),
    )


# ------------------------------ Pure-JAX reference ---------------------------


def reference_forward(x, params):
    B, _ = x.shape
    h = x[:, None, :]                                                # (B, 1, L)
    h = jax.lax.conv_general_dilated(
        h, params["w1"], (1,), "VALID",
        dimension_numbers=("NCH", "OIH", "NCH"), precision=_HI)
    h = _prelu(h + params["b1"][None, :, None], params["a1"])
    Bc, C, T = h.shape
    h = h[:, :, : (T // 4) * 4].reshape(Bc, C, T // 4, 4).max(axis=-1)
    h = jax.lax.conv_general_dilated(
        h, params["w2"], (1,), "VALID",
        dimension_numbers=("NCH", "OIH", "NCH"), precision=_HI)
    h = _prelu(h + params["b2"][None, :, None], params["a2"])
    Bc, C, T = h.shape
    h = h[:, :, : (T // 4) * 4].reshape(Bc, C, T // 4, 4).max(axis=-1)
    h = h.reshape(B, -1)                                             # NCW flatten
    h = _prelu(jnp.dot(h, params["wfc1"].T, precision=_HI) + params["bfc1"],
               params["a3"])
    h = _prelu(jnp.dot(h, params["wfc2"].T, precision=_HI) + params["bfc2"],
               params["a4"])
    h = _prelu(jnp.dot(h, params["wfc3"].T, precision=_HI) + params["bfc3"],
               params["a5"])
    return jnp.dot(h, params["wfc4"].T, precision=_HI) + params["bfc4"]


# ----------------------------------- Main ------------------------------------

if __name__ == "__main__":
    B, L, out_dim = 2, 148, 10        # L=148 -> conv/pool pipeline -> 64*8 = 512
    key = jax.random.PRNGKey(0)
    kx, kparam = jax.random.split(key)
    x = jax.random.normal(kx, (B, L), dtype=jnp.float32)

    L1 = L - K + 1
    P1 = L1 // 4
    L2 = P1 - K + 1
    P2 = L2 // 4
    fc_in = C2 * P2                   # LazyLinear(512) materializes at 512
    params = init_params(kparam, out_dim=out_dim, fc_in=fc_in)
    kparams = prepare_kernel_params(params)   # one-time weight re-layout

    out = jax.block_until_ready(convo1dnet_forward(x, kparams))
    assert out.shape == (B, out_dim), out.shape

    ref = jax.block_until_ready(reference_forward(x, params))
    # Kernel matmuls run at DEFAULT (single bf16-pass) MXU precision per the
    # perf review; the reference runs at HIGHEST, so allow ~1% numerical drift.
    np.testing.assert_allclose(np.asarray(out), np.asarray(ref),
                               rtol=2e-2, atol=2e-2)

    print("KERNEL_OK")
</pallas_src>

<mosaic_0001>
module attributes {stable_mosaic.version = 11 : i64} {
  func.func @kernel(%arg0: memref<5xf32, #tpu.memory_space<smem>>, %arg1: memref<80x8xf32, #tpu.memory_space<vmem>>, %arg2: memref<8x128xf32, #tpu.memory_space<vmem>>, %arg3: memref<1x128xf32, #tpu.memory_space<vmem>>, %arg4: memref<5x32x64xf32, #tpu.memory_space<vmem>>, %arg5: memref<1x64xf32, #tpu.memory_space<vmem>>, %arg6: memref<512x512xf32, #tpu.memory_space<any>>, %arg7: memref<1x512xf32, #tpu.memory_space<vmem>>, %arg8: memref<512x256xf32, #tpu.memory_space<any>>, %arg9: memref<1x256xf32, #tpu.memory_space<vmem>>, %arg10: memref<256x128xf32, #tpu.memory_space<vmem>>, %arg11: memref<1x128xf32, #tpu.memory_space<vmem>>, %arg12: memref<128x10xf32, #tpu.memory_space<vmem>>, %arg13: memref<1x10xf32, #tpu.memory_space<vmem>>, %arg14: memref<2x10xf32, #tpu.memory_space<vmem>>, %arg15: memref<512x512xf32, #tpu.memory_space<vmem>>, %arg16: memref<512x256xf32, #tpu.memory_space<vmem>>, %arg17: memref<2x!tpu.dma_semaphore, #tpu.memory_space<semaphore_mem>>, %arg18: memref<2x512xf32, #tpu.memory_space<vmem>>) attributes {dimension_semantics = [], scalar_prefetch = 0 : i64, scratch_operands = 4 : i64, tpu.core_type = #tpu.core_type<tc>} {
    %c0_i32 = arith.constant 0 : i32
    %0 = tpu.memref_slice %arg17[%c0_i32] : memref<2x!tpu.dma_semaphore, #tpu.memory_space<semaphore_mem>> -> memref<1x!tpu.dma_semaphore, #tpu.memory_space<semaphore_mem>>
    %1 = tpu.memref_squeeze %0 : memref<1x!tpu.dma_semaphore, #tpu.memory_space<semaphore_mem>> -> memref<!tpu.dma_semaphore, #tpu.memory_space<semaphore_mem>>
    tpu.enqueue_dma source(%arg6 : memref<512x512xf32, #tpu.memory_space<any>>) target(%arg15 : memref<512x512xf32, #tpu.memory_space<vmem>>) target_semaphore(%1 : memref<!tpu.dma_semaphore, #tpu.memory_space<semaphore_mem>>)
    %c1_i32 = arith.constant 1 : i32
    %2 = tpu.memref_slice %arg17[%c1_i32] : memref<2x!tpu.dma_semaphore, #tpu.memory_space<semaphore_mem>> -> memref<1x!tpu.dma_semaphore, #tpu.memory_space<semaphore_mem>>
    %3 = tpu.memref_squeeze %2 : memref<1x!tpu.dma_semaphore, #tpu.memory_space<semaphore_mem>> -> memref<!tpu.dma_semaphore, #tpu.memory_space<semaphore_mem>>
    tpu.enqueue_dma source(%arg8 : memref<512x256xf32, #tpu.memory_space<any>>) target(%arg16 : memref<512x256xf32, #tpu.memory_space<vmem>>) target_semaphore(%3 : memref<!tpu.dma_semaphore, #tpu.memory_space<semaphore_mem>>)
    %c0 = arith.constant 0 : index
    %4 = memref.load %arg0[%c0] : memref<5xf32, #tpu.memory_space<smem>>
    %c1 = arith.constant 1 : index
    %5 = memref.load %arg0[%c1] : memref<5xf32, #tpu.memory_space<smem>>
    %c2 = arith.constant 2 : index
    %6 = memref.load %arg0[%c2] : memref<5xf32, #tpu.memory_space<smem>>
    %c3 = arith.constant 3 : index
    %7 = memref.load %arg0[%c3] : memref<5xf32, #tpu.memory_space<smem>>
    %c4 = arith.constant 4 : index
    %8 = memref.load %arg0[%c4] : memref<5xf32, #tpu.memory_space<smem>>
    %c0_0 = arith.constant 0 : index
    %c0_1 = arith.constant 0 : index
    %9 = vector.load %arg1[%c0_0, %c0_1] : memref<80x8xf32, #tpu.memory_space<vmem>>, vector<80x8xf32>
    %c0_2 = arith.constant 0 : index
    %c0_3 = arith.constant 0 : index
    %10 = vector.load %arg2[%c0_2, %c0_3] : memref<8x128xf32, #tpu.memory_space<vmem>>, vector<8x128xf32>
    %cst = arith.constant dense<0.000000e+00> : vector<80x128xf32>
    %11 = tpu.matmul %9, %10, %cst {dimension_numbers = #tpu.dot_dimension_numbers<[1], [0], [0], [1], [0, 0, 1, 1], [], []>} : vector<80x8xf32>, vector<8x128xf32>, vector<80x128xf32> -> vector<80x128xf32>
    %c0_4 = arith.constant 0 : index
    %c0_5 = arith.constant 0 : index
    %12 = vector.load %arg3[%c0_4, %c0_5] : memref<1x128xf32, #tpu.memory_space<vmem>>, vector<1x128xf32>
    %13 = vector.broadcast %12 : vector<1x128xf32> to vector<80x128xf32>
    %14 = arith.addf %11, %13 : vector<80x128xf32>
    %cst_6 = arith.constant 0.000000e+00 : f32
    %15 = vector.broadcast %cst_6 : f32 to vector<80x128xf32>
    %16 = arith.cmpf oge, %14, %15 : vector<80x128xf32>
    %17 = vector.broadcast %4 : f32 to vector<80x128xf32>
    %18 = arith.mulf %17, %14 : vector<80x128xf32>
    %19 = arith.select %16, %14, %18 : vector<80x128xi1>, vector<80x128xf32>
    %20 = vector.extract_strided_slice %19 {offsets = [0, 0], sizes = [80, 32], strides = [1, 1]} : vector<80x128xf32> to vector<80x32xf32>
    %21 = vector.extract_strided_slice %19 {offsets = [0, 32], sizes = [80, 32], strides = [1, 1]} : vector<80x128xf32> to vector<80x32xf32>
    %22 = arith.maximumf %20, %21 : vector<80x32xf32>
    %23 = vector.extract_strided_slice %19 {offsets = [0, 64], sizes = [80, 32], strides = [1, 1]} : vector<80x128xf32> to vector<80x32xf32>
    %24 = vector.extract_strided_slice %19 {offsets = [0, 96], sizes = [80, 32], strides = [1, 1]} : vector<80x128xf32> to vector<80x32xf32>
    %25 = arith.maximumf %23, %24 : vector<80x32xf32>
    %26 = arith.maximumf %22, %25 : vector<80x32xf32>
    %27 = vector.shape_cast %26 : vector<80x32xf32> to vector<2x40x32xf32>
    %28 = vector.extract_strided_slice %27 {offsets = [0, 0, 0], sizes = [2, 32, 32], strides = [1, 1, 1]} : vector<2x40x32xf32> to vector<2x32x32xf32>
    %29 = vector.shape_cast %28 : vector<2x32x32xf32> to vector<64x32xf32>
    %c0_7 = arith.constant 0 : index
    %c0_8 = arith.constant 0 : index
    %c0_9 = arith.constant 0 : index
    %30 = vector.load %arg4[%c0_7, %c0_8, %c0_9] : memref<5x32x64xf32, #tpu.memory_space<vmem>>, vector<1x32x64xf32>
    %31 = vector.shape_cast %30 : vector<1x32x64xf32> to vector<32x64xf32>
    %cst_10 = arith.constant dense<0.000000e+00> : vector<64x64xf32>
    %32 = tpu.matmul %29, %31, %cst_10 {dimension_numbers = #tpu.dot_dimension_numbers<[1], [0], [0], [1], [0, 0, 1, 1], [], []>} : vector<64x32xf32>, vector<32x64xf32>, vector<64x64xf32> -> vector<64x64xf32>
    %33 = vector.extract_strided_slice %27 {offsets = [0, 1, 0], sizes = [2, 32, 32], strides = [1, 1, 1]} : vector<2x40x32xf32> to vector<2x32x32xf32>
    %34 = vector.shape_cast %33 : vector<2x32x32xf32> to vector<64x32xf32>
    %c1_11 = arith.constant 1 : index
    %c0_12 = arith.constant 0 : index
    %c0_13 = arith.constant 0 : index
    %35 = vector.load %arg4[%c1_11, %c0_12, %c0_13] : memref<5x32x64xf32, #tpu.memory_space<vmem>>, vector<1x32x64xf32>
    %36 = vector.shape_cast %35 : vector<1x32x64xf32> to vector<32x64xf32>
    %cst_14 = arith.constant dense<0.000000e+00> : vector<64x64xf32>
    %37 = tpu.matmul %34, %36, %cst_14 {dimension_numbers = #tpu.dot_dimension_numbers<[1], [0], [0], [1], [0, 0, 1, 1], [], []>} : vector<64x32xf32>, vector<32x64xf32>, vector<64x64xf32> -> vector<64x64xf32>
    %38 = arith.addf %32, %37 : vector<64x64xf32>
    %39 = vector.extract_strided_slice %27 {offsets = [0, 2, 0], sizes = [2, 32, 32], strides = [1, 1, 1]} : vector<2x40x32xf32> to vector<2x32x32xf32>
    %40 = vector.shape_cast %39 : vector<2x32x32xf32> to vector<64x32xf32>
    %c2_15 = arith.constant 2 : index
    %c0_16 = arith.constant 0 : index
    %c0_17 = arith.constant 0 : index
    %41 = vector.load %arg4[%c2_15, %c0_16, %c0_17] : memref<5x32x64xf32, #tpu.memory_space<vmem>>, vector<1x32x64xf32>
    %42 = vector.shape_cast %41 : vector<1x32x64xf32> to vector<32x64xf32>
    %cst_18 = arith.constant dense<0.000000e+00> : vector<64x64xf32>
    %43 = tpu.matmul %40, %42, %cst_18 {dimension_numbers = #tpu.dot_dimension_numbers<[1], [0], [0], [1], [0, 0, 1, 1], [], []>} : vector<64x32xf32>, vector<32x64xf32>, vector<64x64xf32> -> vector<64x64xf32>
    %44 = arith.addf %38, %43 : vector<64x64xf32>
    %45 = vector.extract_strided_slice %27 {offsets = [0, 3, 0], sizes = [2, 32, 32], strides = [1, 1, 1]} : vector<2x40x32xf32> to vector<2x32x32xf32>
    %46 = vector.shape_cast %45 : vector<2x32x32xf32> to vector<64x32xf32>
    %c3_19 = arith.constant 3 : index
    %c0_20 = arith.constant 0 : index
    %c0_21 = arith.constant 0 : index
    %47 = vector.load %arg4[%c3_19, %c0_20, %c0_21] : memref<5x32x64xf32, #tpu.memory_space<vmem>>, vector<1x32x64xf32>
    %48 = vector.shape_cast %47 : vector<1x32x64xf32> to vector<32x64xf32>
    %cst_22 = arith.constant dense<0.000000e+00> : vector<64x64xf32>
    %49 = tpu.matmul %46, %48, %cst_22 {dimension_numbers = #tpu.dot_dimension_numbers<[1], [0], [0], [1], [0, 0, 1, 1], [], []>} : vector<64x32xf32>, vector<32x64xf32>, vector<64x64xf32> -> vector<64x64xf32>
    %50 = arith.addf %44, %49 : vector<64x64xf32>
    %51 = vector.extract_strided_slice %27 {offsets = [0, 4, 0], sizes = [2, 32, 32], strides = [1, 1, 1]} : vector<2x40x32xf32> to vector<2x32x32xf32>
    %52 = vector.shape_cast %51 : vector<2x32x32xf32> to vector<64x32xf32>
    %c4_23 = arith.constant 4 : index
    %c0_24 = arith.constant 0 : index
    %c0_25 = arith.constant 0 : index
    %53 = vector.load %arg4[%c4_23, %c0_24, %c0_25] : memref<5x32x64xf32, #tpu.memory_space<vmem>>, vector<1x32x64xf32>
    %54 = vector.shape_cast %53 : vector<1x32x64xf32> to vector<32x64xf32>
    %cst_26 = arith.constant dense<0.000000e+00> : vector<64x64xf32>
    %55 = tpu.matmul %52, %54, %cst_26 {dimension_numbers = #tpu.dot_dimension_numbers<[1], [0], [0], [1], [0, 0, 1, 1], [], []>} : vector<64x32xf32>, vector<32x64xf32>, vector<64x64xf32> -> vector<64x64xf32>
    %56 = arith.addf %50, %55 : vector<64x64xf32>
    %c0_27 = arith.constant 0 : index
    %c0_28 = arith.constant 0 : index
    %57 = vector.load %arg5[%c0_27, %c0_28] : memref<1x64xf32, #tpu.memory_space<vmem>>, vector<1x64xf32>
    %58 = vector.broadcast %57 : vector<1x64xf32> to vector<64x64xf32>
    %59 = arith.addf %56, %58 : vector<64x64xf32>
    %cst_29 = arith.constant 0.000000e+00 : f32
    %60 = vector.broadcast %cst_29 : f32 to vector<64x64xf32>
    %61 = arith.cmpf oge, %59, %60 : vector<64x64xf32>
    %62 = vector.broadcast %5 : f32 to vector<64x64xf32>
    %63 = arith.mulf %62, %59 : vector<64x64xf32>
    %64 = arith.select %61, %59, %63 : vector<64x64xi1>, vector<64x64xf32>
    %65 = vector.shape_cast %64 : vector<64x64xf32> to vector<2x32x64xf32>
    %66 = vector.extract_strided_slice %65 {offsets = [0, 0, 0], sizes = [2, 4, 64], strides = [1, 1, 1]} : vector<2x32x64xf32> to vector<2x4x64xf32>
    %cst_30 = arith.constant dense<0xFF800000> : vector<2x64xf32>
    %67 = vector.multi_reduction <maximumf>, %66, %cst_30 [1] : vector<2x4x64xf32> to vector<2x64xf32>
    %c0_31 = arith.constant 0 : index
    %c0_32 = arith.constant 0 : index
    %68 = vector.load %arg18[%c0_31, %c0_32] : memref<2x512xf32, #tpu.memory_space<vmem>>, vector<2x64xf32>
    tpu.vector_store %arg18[%c0_31, %c0_32], %67 {strides = array<i32>} : memref<2x512xf32, #tpu.memory_space<vmem>>, vector<2x64xf32>,
    %69 = vector.extract_strided_slice %65 {offsets = [0, 4, 0], sizes = [2, 4, 64], strides = [1, 1, 1]} : vector<2x32x64xf32> to vector<2x4x64xf32>
    %cst_33 = arith.constant dense<0xFF800000> : vector<2x64xf32>
    %70 = vector.multi_reduction <maximumf>, %69, %cst_33 [1] : vector<2x4x64xf32> to vector<2x64xf32>
    %c0_34 = arith.constant 0 : index
    %c64 = arith.constant 64 : index
    %71 = vector.load %arg18[%c0_34, %c64] : memref<2x512xf32, #tpu.memory_space<vmem>>, vector<2x64xf32>
    tpu.vector_store %arg18[%c0_34, %c64], %70 {strides = array<i32>} : memref<2x512xf32, #tpu.memory_space<vmem>>, vector<2x64xf32>,
    %72 = vector.extract_strided_slice %65 {offsets = [0, 8, 0], sizes = [2, 4, 64], strides = [1, 1, 1]} : vector<2x32x64xf32> to vector<2x4x64xf32>
    %cst_35 = arith.constant dense<0xFF800000> : vector<2x64xf32>
    %73 = vector.multi_reduction <maximumf>, %72, %cst_35 [1] : vector<2x4x64xf32> to vector<2x64xf32>
    %c0_36 = arith.constant 0 : index
    %c128 = arith.constant 128 : index
    %74 = vector.load %arg18[%c0_36, %c128] : memref<2x512xf32, #tpu.memory_space<vmem>>, vector<2x64xf32>
    tpu.vector_store %arg18[%c0_36, %c128], %73 {strides = array<i32>} : memref<2x512xf32, #tpu.memory_space<vmem>>, vector<2x64xf32>,
    %75 = vector.extract_strided_slice %65 {offsets = [0, 12, 0], sizes = [2, 4, 64], strides = [1, 1, 1]} : vector<2x32x64xf32> to vector<2x4x64xf32>
    %cst_37 = arith.constant dense<0xFF800000> : vector<2x64xf32>
    %76 = vector.multi_reduction <maximumf>, %75, %cst_37 [1] : vector<2x4x64xf32> to vector<2x64xf32>
    %c0_38 = arith.constant 0 : index
    %c192 = arith.constant 192 : index
    %77 = vector.load %arg18[%c0_38, %c192] : memref<2x512xf32, #tpu.memory_space<vmem>>, vector<2x64xf32>
    tpu.vector_store %arg18[%c0_38, %c192], %76 {strides = array<i32>} : memref<2x512xf32, #tpu.memory_space<vmem>>, vector<2x64xf32>,
    %78 = vector.extract_strided_slice %65 {offsets = [0, 16, 0], sizes = [2, 4, 64], strides = [1, 1, 1]} : vector<2x32x64xf32> to vector<2x4x64xf32>
    %cst_39 = arith.constant dense<0xFF800000> : vector<2x64xf32>
    %79 = vector.multi_reduction <maximumf>, %78, %cst_39 [1] : vector<2x4x64xf32> to vector<2x64xf32>
    %c0_40 = arith.constant 0 : index
    %c256 = arith.constant 256 : index
    %80 = vector.load %arg18[%c0_40, %c256] : memref<2x512xf32, #tpu.memory_space<vmem>>, vector<2x64xf32>
    tpu.vector_store %arg18[%c0_40, %c256], %79 {strides = array<i32>} : memref<2x512xf32, #tpu.memory_space<vmem>>, vector<2x64xf32>,
    %81 = vector.extract_strided_slice %65 {offsets = [0, 20, 0], sizes = [2, 4, 64], strides = [1, 1, 1]} : vector<2x32x64xf32> to vector<2x4x64xf32>
    %cst_41 = arith.constant dense<0xFF800000> : vector<2x64xf32>
    %82 = vector.multi_reduction <maximumf>, %81, %cst_41 [1] : vector<2x4x64xf32> to vector<2x64xf32>
    %c0_42 = arith.constant 0 : index
    %c320 = arith.constant 320 : index
    %83 = vector.load %arg18[%c0_42, %c320] : memref<2x512xf32, #tpu.memory_space<vmem>>, vector<2x64xf32>
    tpu.vector_store %arg18[%c0_42, %c320], %82 {strides = array<i32>} : memref<2x512xf32, #tpu.memory_space<vmem>>, vector<2x64xf32>,
    %84 = vector.extract_strided_slice %65 {offsets = [0, 24, 0], sizes = [2, 4, 64], strides = [1, 1, 1]} : vector<2x32x64xf32> to vector<2x4x64xf32>
    %cst_43 = arith.constant dense<0xFF800000> : vector<2x64xf32>
    %85 = vector.multi_reduction <maximumf>, %84, %cst_43 [1] : vector<2x4x64xf32> to vector<2x64xf32>
    %c0_44 = arith.constant 0 : index
    %c384 = arith.constant 384 : index
    %86 = vector.load %arg18[%c0_44, %c384] : memref<2x512xf32, #tpu.memory_space<vmem>>, vector<2x64xf32>
    tpu.vector_store %arg18[%c0_44, %c384], %85 {strides = array<i32>} : memref<2x512xf32, #tpu.memory_space<vmem>>, vector<2x64xf32>,
    %87 = vector.extract_strided_slice %65 {offsets = [0, 28, 0], sizes = [2, 4, 64], strides = [1, 1, 1]} : vector<2x32x64xf32> to vector<2x4x64xf32>
    %cst_45 = arith.constant dense<0xFF800000> : vector<2x64xf32>
    %88 = vector.multi_reduction <maximumf>, %87, %cst_45 [1] : vector<2x4x64xf32> to vector<2x64xf32>
    %c0_46 = arith.constant 0 : index
    %c448 = arith.constant 448 : index
    %89 = vector.load %arg18[%c0_46, %c448] : memref<2x512xf32, #tpu.memory_space<vmem>>, vector<2x64xf32>
    tpu.vector_store %arg18[%c0_46, %c448], %88 {strides = array<i32>} : memref<2x512xf32, #tpu.memory_space<vmem>>, vector<2x64xf32>,
    %c0_i32_47 = arith.constant 0 : i32
    %90 = tpu.memref_slice %arg17[%c0_i32_47] : memref<2x!tpu.dma_semaphore, #tpu.memory_space<semaphore_mem>> -> memref<1x!tpu.dma_semaphore, #tpu.memory_space<semaphore_mem>>
    %91 = tpu.memref_squeeze %90 : memref<1x!tpu.dma_semaphore, #tpu.memory_space<semaphore_mem>> -> memref<!tpu.dma_semaphore, #tpu.memory_space<semaphore_mem>>
    tpu.wait_dma2 semaphore(%91 : memref<!tpu.dma_semaphore, #tpu.memory_space<semaphore_mem>>) src(%arg6 : memref<512x512xf32, #tpu.memory_space<any>>) dst(%arg15 : memref<512x512xf32, #tpu.memory_space<vmem>>)
    %c0_48 = arith.constant 0 : index
    %c0_49 = arith.constant 0 : index
    %92 = vector.load %arg18[%c0_48, %c0_49] : memref<2x512xf32, #tpu.memory_space<vmem>>, vector<2x512xf32>
    %c0_50 = arith.constant 0 : index
    %c0_51 = arith.constant 0 : index
    %93 = vector.load %arg15[%c0_50, %c0_51] : memref<512x512xf32, #tpu.memory_space<vmem>>, vector<512x512xf32>
    %cst_52 = arith.constant dense<0.000000e+00> : vector<2x512xf32>
    %94 = tpu.matmul %92, %93, %cst_52 {dimension_numbers = #tpu.dot_dimension_numbers<[1], [0], [0], [1], [0, 0, 1, 1], [], []>} : vector<2x512xf32>, vector<512x512xf32>, vector<2x512xf32> -> vector<2x512xf32>
    %c0_53 = arith.constant 0 : index
    %c0_54 = arith.constant 0 : index
    %95 = vector.load %arg7[%c0_53, %c0_54] : memref<1x512xf32, #tpu.memory_space<vmem>>, vector<1x512xf32>
    %96 = vector.broadcast %95 : vector<1x512xf32> to vector<2x512xf32>
    %97 = arith.addf %94, %96 : vector<2x512xf32>
    %cst_55 = arith.constant 0.000000e+00 : f32
    %98 = vector.broadcast %cst_55 : f32 to vector<2x512xf32>
    %99 = arith.cmpf oge, %97, %98 : vector<2x512xf32>
    %100 = vector.broadcast %6 : f32 to vector<2x512xf32>
    %101 = arith.mulf %100, %97 : vector<2x512xf32>
    %102 = arith.select %99, %97, %101 : vector<2x512xi1>, vector<2x512xf32>
    %c1_i32_56 = arith.constant 1 : i32
    %103 = tpu.memref_slice %arg17[%c1_i32_56] : memref<2x!tpu.dma_semaphore, #tpu.memory_space<semaphore_mem>> -> memref<1x!tpu.dma_semaphore, #tpu.memory_space<semaphore_mem>>
    %104 = tpu.memref_squeeze %103 : memref<1x!tpu.dma_semaphore, #tpu.memory_space<semaphore_mem>> -> memref<!tpu.dma_semaphore, #tpu.memory_space<semaphore_mem>>
    tpu.wait_dma2 semaphore(%104 : memref<!tpu.dma_semaphore, #tpu.memory_space<semaphore_mem>>) src(%arg8 : memref<512x256xf32, #tpu.memory_space<any>>) dst(%arg16 : memref<512x256xf32, #tpu.memory_space<vmem>>)
    %c0_57 = arith.constant 0 : index
    %c0_58 = arith.constant 0 : index
    %105 = vector.load %arg16[%c0_57, %c0_58] : memref<512x256xf32, #tpu.memory_space<vmem>>, vector<512x256xf32>
    %cst_59 = arith.constant dense<0.000000e+00> : vector<2x256xf32>
    %106 = tpu.matmul %102, %105, %cst_59 {dimension_numbers = #tpu.dot_dimension_numbers<[1], [0], [0], [1], [0, 0, 1, 1], [], []>} : vector<2x512xf32>, vector<512x256xf32>, vector<2x256xf32> -> vector<2x256xf32>
    %c0_60 = arith.constant 0 : index
    %c0_61 = arith.constant 0 : index
    %107 = vector.load %arg9[%c0_60, %c0_61] : memref<1x256xf32, #tpu.memory_space<vmem>>, vector<1x256xf32>
    %108 = vector.broadcast %107 : vector<1x256xf32> to vector<2x256xf32>
    %109 = arith.addf %106, %108 : vector<2x256xf32>
    %cst_62 = arith.constant 0.000000e+00 : f32
    %110 = vector.broadcast %cst_62 : f32 to vector<2x256xf32>
    %111 = arith.cmpf oge, %109, %110 : vector<2x256xf32>
    %112 = vector.broadcast %7 : f32 to vector<2x256xf32>
    %113 = arith.mulf %112, %109 : vector<2x256xf32>
    %114 = arith.select %111, %109, %113 : vector<2x256xi1>, vector<2x256xf32>
    %c0_63 = arith.constant 0 : index
    %c0_64 = arith.constant 0 : index
    %115 = vector.load %arg10[%c0_63, %c0_64] : memref<256x128xf32, #tpu.memory_space<vmem>>, vector<256x128xf32>
    %cst_65 = arith.constant dense<0.000000e+00> : vector<2x128xf32>
    %116 = tpu.matmul %114, %115, %cst_65 {dimension_numbers = #tpu.dot_dimension_numbers<[1], [0], [0], [1], [0, 0, 1, 1], [], []>} : vector<2x256xf32>, vector<256x128xf32>, vector<2x128xf32> -> vector<2x128xf32>
    %c0_66 = arith.constant 0 : index
    %c0_67 = arith.constant 0 : index
    %117 = vector.load %arg11[%c0_66, %c0_67] : memref<1x128xf32, #tpu.memory_space<vmem>>, vector<1x128xf32>
    %118 = vector.broadcast %117 : vector<1x128xf32> to vector<2x128xf32>
    %119 = arith.addf %116, %118 : vector<2x128xf32>
    %cst_68 = arith.constant 0.000000e+00 : f32
    %120 = vector.broadcast %cst_68 : f32 to vector<2x128xf32>
    %121 = arith.cmpf oge, %119, %120 : vector<2x128xf32>
    %122 = vector.broadcast %8 : f32 to vector<2x128xf32>
    %123 = arith.mulf %122, %119 : vector<2x128xf32>
    %124 = arith.select %121, %119, %123 : vector<2x128xi1>, vector<2x128xf32>
    %c0_69 = arith.constant 0 : index
    %c0_70 = arith.constant 0 : index
    %125 = vector.load %arg12[%c0_69, %c0_70] : memref<128x10xf32, #tpu.memory_space<vmem>>, vector<128x10xf32>
    %cst_71 = arith.constant dense<0.000000e+00> : vector<2x10xf32>
    %126 = tpu.matmul %124, %125, %cst_71 {dimension_numbers = #tpu.dot_dimension_numbers<[1], [0], [0], [1], [0, 0, 1, 1], [], []>} : vector<2x128xf32>, vector<128x10xf32>, vector<2x10xf32> -> vector<2x10xf32>
    %c0_72 = arith.constant 0 : index
    %c0_73 = arith.constant 0 : index
    %127 = vector.load %arg13[%c0_72, %c0_73] : memref<1x10xf32, #tpu.memory_space<vmem>>, vector<1x10xf32>
    %128 = vector.broadcast %127 : vector<1x10xf32> to vector<2x10xf32>
    %129 = arith.addf %126, %128 : vector<2x10xf32>
    %c0_74 = arith.constant 0 : index
    %c0_75 = arith.constant 0 : index
    %130 = vector.load %arg14[%c0_74, %c0_75] : memref<2x10xf32, #tpu.memory_space<vmem>>, vector<2x10xf32>
    tpu.vector_store %arg14[%c0_74, %c0_75], %129 {strides = array<i32>} : memref<2x10xf32, #tpu.memory_space<vmem>>, vector<2x10xf32>,
    return
  }
}

</mosaic_0001>

<bundles_post_ra>
// kernel: convo1dnet_forward.1
= control target key start
LH: loop header
LB: loop body
LE: loop exit
PB: predicated region body
PF: predicated region fallthrough
CT: control target
= control target key end

     0   :  { %19 = vsyncpa [#allocation8], 0  ;;  %s2962_s0 = inlined_call_operand.vmem [shape: f32[5], index: 0, kind: input, shape index: {}]   ;;  %s2963_s1 = inlined_call_operand.vmem [shape: f32[80,8], index: 1, kind: input, shape index: {}]   ;;  %s2964_s2 = inlined_call_operand.vmem [shape: f32[8,128], index: 2, kind: input, shape index: {}]   ;;  %s2965_s3 = inlined_call_operand.vmem [shape: f32[1,128], index: 3, kind: input, shape index: {}]   ;;  %s2966_s4 = inlined_call_operand.vmem [shape: f32[5,32,64], index: 4, kind: input, shape index: {}]   ;;  %s2967_s5 = inlined_call_operand.vmem [shape: f32[1,64], index: 5, kind: input, shape index: {}]   ;;  %s2968_s6 = inlined_call_operand.hbm [shape: f32[512,512], index: 6, kind: input, shape index: {}]   ;;  %s2969_s7 = inlined_call_operand.vmem [shape: f32[1,512], index: 7, kind: input, shape index: {}]   ;;  %s2970_s8 = inlined_call_operand.hbm [shape: f32[512,256], index: 8, kind: input, shape index: {}]   ;;  %s2971_s9 = inlined_call_operand.vmem [shape: f32[1,256], index: 9, kind: input, shape index: {}]   ;;  %s2972_s10 = inlined_call_operand.vmem [shape: f32[256,128], index: 10, kind: input, shape index: {}]   ;;  %s2973_s11 = inlined_call_operand.vmem [shape: f32[1,128], index: 11, kind: input, shape index: {}]   ;;  %s2974_s12 = inlined_call_operand.vmem [shape: f32[128,10], index: 12, kind: input, shape index: {}]   ;;  %s2975_s13 = inlined_call_operand.vmem [shape: f32[1,10], index: 13, kind: input, shape index: {}]   ;;  %s2976_s14 = inlined_call_operand.hbm [shape: f32[2,10], index: 14, kind: output, shape index: {}]  }
   0x1   :  { %20 = vsyncpa [#allocation7], 0  ;;  %s26_s15 = sshll.u32 %s2962_s0, 4  ;;  %s2232_s16 = smov [#allocation6]   ;;  %s27_s15 = int_to_ptr.vmem [resolvable:$true] %s26_s15 }
   0x2   :  { %29 = dma.vmem_to_smem %s27_s15, 16, %s2232_s16, [#allocation8]  }
   0x3   :  { %2224 = dma.done.wait [#allocation8], 16  }
   0x4   :  { %2225 = vsyncadd [#allocation8], 4294967280 }
   0x5   :  { %56 = sfence }
   0x6   :  { %s2316_s17 = sld [smem:[#allocation6 + $0x2]]  ;;  %v99_v0 = vld [vmem:[%s2964_s2] sm:$0xff]  ;;  %vm104_vm0 = vcmask 64512   ;;  %v90_v2 = vld [vmem:[%s2963_s1 + $0x8] sm:$0xff]  ;;  %v91_v3 = vld [vmem:[%s2963_s1 + $0x10] sm:$0xff]  ;;  %s2233_s28 = smov 96  }
   0x7   :  { %v89_v1 = vld [vmem:[%s2963_s1] sm:$0xff]  ;;  %s2324_s22 = sld [smem:[#allocation6 + $0x3]]  ;;  %150 = vmatpush.msra.mxu0 %v99_v0  ;;  %v92_v4 = vld [vmem:[%s2963_s1 + $0x18] sm:$0xff]  ;;  %v94_v6 = vld [vmem:[%s2963_s1 + $0x28] sm:$0xff]  ;;  %vm351_vm11 = vcmask 261120   ;;  %vm327_vm12 = vcmask 1046528  }
   0x8   :  { %s2326_s0 = sld [smem:[#allocation6 + $0x4]]  ;;  %2062 = vmatmul.msk.f32.vlgmr.msra.gmra.mxu0 %vm104_vm0, %v89_v1  ;;  %v93_v5 = vld [vmem:[%s2963_s1 + $0x20] sm:$0xff]  ;;  %v95_v7 = vld [vmem:[%s2963_s1 + $0x30] sm:$0xff]  ;;  %v96_v8 = vld [vmem:[%s2963_s1 + $0x38] sm:$0xff]  ;;  %vm466_vm13 = vcmask 1045504   ;;  %vm555_vm14 = vcmask 1044480  }
   0x9   :  { %v97_v9 = vld [vmem:[%s2963_s1 + $0x40] sm:$0xff]  ;;  %v98_v10 = vld [vmem:[%s2963_s1 + $0x48] sm:$0xff]  ;;  %s84_s2 = sld [smem:[#allocation6]]  ;;  %s2234_s1 = smov 64   ;;  %v316_v1 = vld [vmem:[%s2966_s4 + $0x18] sm:$0xff]  ;;  %vm644_vm15 = vcmask 1043456  }
   0xa   :  { %v2368_v11 = vld [vmem:[%s2965_s3] ss:$0 sm:$0xff]  ;;  %437 = vmatpush.msra.mxu2 %v316_v1  ;;  %s64_s25 = sshll.u32 %s2968_s6, 4  ;;  %s2236_s3 = smov [#allocation3]   ;;  %s65_s25 = int_to_ptr.hbm [resolvable:$true] %s64_s25 }
   0xb   :  { %s80_s29 = sshll.u32 %s2236_s3, 4  ;;  %s81_s29 = int_to_ptr.vmem [resolvable:$true] %s80_s29 }
   0xf   :  { %v2370_v13 = vstv %s84_s2  ;;  %s2235_s2 = smov [#allocation2]  }
  0x10   :  { %2063 = vmatmul.msk.f32.gmra.mxu0 %vm104_vm0, %v90_v2  ;;  %v315_v2 = vld [vmem:[%s2966_s4 + $0x10] sm:$0xff]  ;;  %s66_s26 = sshll.u32 %s2235_s2, 4  ;;  %s67_s26 = int_to_ptr.vmem [resolvable:$true] %s66_s26 }
  0x11   :  { %438 = vmatpush.msra.mxu2 %v315_v2  ;;  %69 = dma.hbm_to_vmem [thread:$0]  %s65_s25, 32768, %s67_s26, [#allocation4] }
  0x18   :  { %2064 = vmatmul.msk.f32.gmra.mxu0 %vm104_vm0, %v91_v3  ;;  %v314_v3 = vld [vmem:[%s2966_s4 + $0x8] sm:$0xff] }
  0x19   :  { %439 = vmatpush.msra.mxu2 %v314_v3 }
  0x20   :  { %2065 = vmatmul.msk.f32.gmra.mxu0 %vm104_vm0, %v92_v4 }
  0x28   :  { %2066 = vmatmul.msk.f32.gmra.mxu0 %vm104_vm0, %v93_v5 }
  0x30   :  { %2067 = vmatmul.msk.f32.gmra.mxu0 %vm104_vm0, %v94_v6 }
  0x38   :  { %2068 = vmatmul.msk.f32.gmra.mxu0 %vm104_vm0, %v95_v7 }
  0x40   :  { %2069 = vmatmul.msk.f32.gmra.mxu0 %vm104_vm0, %v96_v8  ;;  %v313_v8 = vld [vmem:[%s2966_s4] sm:$0xff] }
  0x41   :  { %440 = vmatpush.msra.mxu2 %v313_v8 }
  0x48   :  { %2070 = vmatmul.msk.f32.gmra.mxu0 %vm104_vm0, %v97_v9 }
  0x50   :  { %2071 = vmatmul.msk.f32.gmra.mxu0 %vm104_vm0, %v98_v10 }
  0x85   :  { %v152_v12 = vpop.f32.mrf.mxu0 }
  0x86   :  { %v153_v14 = vadd.f32 %v2368_v11, %v152_v12  ;;  %v2095_v12 = vld [vmem:[%s2966_s4 + $0x58] sm:$0xff] }
  0x87   :  { %518 = vmatpush.msra.mxu3 %v2095_v12 }
  0x88   :  { %vm182_vm1 = vcmp.ge.f32.partialorder %v153_v14, 0.0  ;;  %v193_v15 = vmul.f32 %v2370_v13, %v153_v14 }
  0x8a   :  { %v203_v16 = vsel %vm182_vm1, %v153_v14, %v193_v15  ;;  %v2074_v15 = vld [vmem:[%s2966_s4 + $0x30] sm:$0xff]  ;;  %vm770_vm1 = vcmask 519168  }
  0x8b   :  { %223 = vrot.lane.b32.xlu0 %v203_v16, %s2233_s28 }
  0x8d   :  { %v155_v17 = vpop.f32.mrf.mxu0 }
  0x8e   :  { %v156_v18 = vadd.f32 %v2368_v11, %v155_v17  ;;  %v2073_v17 = vld [vmem:[%s2966_s4 + $0x28] sm:$0xff] }
  0x90   :  { %v194_v19 = vmul.f32 %v2370_v13, %v156_v18  ;;  %vm183_vm2 = vcmp.ge.f32.partialorder %v156_v18, 0.0 }
  0x92   :  { %v204_v20 = vsel %vm183_vm2, %v156_v18, %v194_v19  ;;  %v2093_v18 = vld [vmem:[%s2966_s4 + $0x48] sm:$0xff]  ;;  %v2072_v19 = vld [vmem:[%s2966_s4 + $0x20] sm:$0xff]  ;;  %vm803_vm2 = vcmask 523268  }
  0x93   :  { %225 = vrot.lane.b32.xlu0 %v204_v20, %s2233_s28 }
  0x95   :  { %v158_v21 = vpop.f32.mrf.mxu0 }
  0x96   :  { %v159_v22 = vadd.f32 %v2368_v11, %v158_v21 }
  0x98   :  { %vm184_vm3 = vcmp.ge.f32.partialorder %v159_v22, 0.0  ;;  %v195_v23 = vmul.f32 %v2370_v13, %v159_v22 }
  0x9a   :  { %v205_v24 = vsel %vm184_vm3, %v159_v22, %v195_v23 }
  0x9b   :  { %227 = vrot.lane.b32.xlu1 %v205_v24, %s2233_s28 }
  0x9d   :  { %v161_v25 = vpop.f32.mrf.mxu0 }
  0x9e   :  { %v162_v26 = vadd.f32 %v2368_v11, %v161_v25 }
  0xa0   :  { %v196_v27 = vmul.f32 %v2370_v13, %v162_v26  ;;  %vm185_vm4 = vcmp.ge.f32.partialorder %v162_v26, 0.0 }
  0xa2   :  { %v206_v28 = vsel %vm185_vm4, %v162_v26, %v196_v27 }
  0xa3   :  { %229 = vrot.lane.b32.xlu1 %v206_v28, %s2233_s28 }
  0xa5   :  { %v164_v29 = vpop.f32.mrf.mxu0 }
  0xa6   :  { %v165_v30 = vadd.f32 %v2368_v11, %v164_v29 }
  0xa8   :  { %vm186_vm5 = vcmp.ge.f32.partialorder %v165_v30, 0.0  ;;  %v197_v31 = vmul.f32 %v2370_v13, %v165_v30 }
  0xaa   :  { %v207_v32 = vsel %vm186_vm5, %v165_v30, %v197_v31 }
  0xab   :  { %231 = vrot.lane.b32.xlu2 %v207_v32, %s2233_s28 }
  0xad   :  { %v167_v33 = vpop.f32.mrf.mxu0 }
  0xae   :  { %v168_v34 = vadd.f32 %v2368_v11, %v167_v33 }
  0xb0   :  { %v198_v35 = vmul.f32 %v2370_v13, %v168_v34  ;;  %vm187_vm6 = vcmp.ge.f32.partialorder %v168_v34, 0.0 }
  0xb2   :  { %v208_v36 = vsel %vm187_vm6, %v168_v34, %v198_v35 }
  0xb3   :  { %233 = vrot.lane.b32.xlu2 %v208_v36, %s2233_s28 }
  0xb5   :  { %v170_v37 = vpop.f32.mrf.mxu0 }
  0xb6   :  { %v171_v38 = vadd.f32 %v2368_v11, %v170_v37 }
  0xb8   :  { %v199_v39 = vmul.f32 %v2370_v13, %v171_v38  ;;  %vm188_vm7 = vcmp.ge.f32.partialorder %v171_v38, 0.0 }
  0xba   :  { %v209_v40 = vsel %vm188_vm7, %v171_v38, %v199_v39 }
  0xbb   :  { %235 = vrot.lane.b32.xlu0 %v209_v40, %s2233_s28 }
  0xbd   :  { %v173_v41 = vpop.f32.mrf.mxu0 }
  0xbe   :  { %v174_v42 = vadd.f32 %v2368_v11, %v173_v41 }
  0xc0   :  { %v200_v43 = vmul.f32 %v2370_v13, %v174_v42  ;;  %vm189_vm8 = vcmp.ge.f32.partialorder %v174_v42, 0.0 }
  0xc2   :  { %v210_v44 = vsel %vm189_vm8, %v174_v42, %v200_v43  ;;  %vm792_vm8 = vcmask 1041409  }
  0xc3   :  { %237 = vrot.lane.b32.xlu1 %v210_v44, %s2233_s28 }
  0xc5   :  { %v176_v45 = vpop.f32.mrf.mxu0 }
  0xc6   :  { %v177_v46 = vadd.f32 %v2368_v11, %v176_v45 }
  0xc8   :  { %v201_v47 = vmul.f32 %v2370_v13, %v177_v46  ;;  %vm190_vm9 = vcmp.ge.f32.partialorder %v177_v46, 0.0 }
  0xca   :  { %v211_v48 = vsel %vm190_vm9, %v177_v46, %v201_v47  ;;  %vm794_vm9 = vcmask 1043459  }
  0xcb   :  { %239 = vrot.lane.b32.xlu1 %v211_v48, %s2233_s28 }
  0xcd   :  { %v179_v51 = vpop.f32.mrf.mxu0 }
  0xce   :  { %v180_v54 = vadd.f32 %v2368_v11, %v179_v51  ;;  %v2075_v11 = vld [vmem:[%s2966_s4 + $0x38] sm:$0xff] }
  0xcf   :  { %380 = vmatpush.msra.mxu1 %v2075_v11 }
  0xd0   :  { %v202_v56 = vmul.f32 %v2370_v13, %v180_v54  ;;  %vm191_vm10 = vcmp.ge.f32.partialorder %v180_v54, 0.0 }
  0xd1   :  { %381 = vmatpush.msra.mxu1 %v2074_v15 }
  0xd2   :  { %v2403_v59 = vsel %vm191_vm10, %v180_v54, %v202_v56  ;;  %vm796_vm10 = vcmask 1045509  }
  0xd3   :  { %382 = vmatpush.msra.mxu1 %v2073_v17 }
  0xd5   :  { %383 = vmatpush.msra.mxu1 %v2072_v19 }
  0xfd   :  { %v224_v49 = vpop.permute.xlu0 %223 }
  0xfe   :  { %v253_v50 = vmax.f32 %v203_v16, %v224_v49  ;;  %v2094_v16 = vld [vmem:[%s2966_s4 + $0x50] sm:$0xff] }
  0xff   :  { %519 = vmatpush.msra.mxu3 %v2094_v16 }
 0x100   :  { %273 = vrot.lane.b32.xlu2 %v253_v50, %s2234_s1 }
 0x101   :  { %520 = vmatpush.msra.mxu3 %v2093_v18 }
 0x105   :  { %v226_v52 = vpop.permute.xlu0 %225  ;;  %v232_v55 = vpop.permute.xlu2 %231 }
 0x106   :  { %v254_v53 = vmax.f32 %v204_v20, %v226_v52  ;;  %v2408_v62 = vmax.f32 %v207_v32, %v232_v55  ;;  %v2092_v20 = vld [vmem:[%s2966_s4 + $0x40] sm:$0xff] }
 0x107   :  { %521 = vmatpush.msra.mxu3 %v2092_v20  ;;  %v2106_v20 = vld [vmem:[%s2966_s4 + $0x70] sm:$0xff] }
 0x108   :  { %275 = vrot.lane.b32.xlu0 %v254_v53, %s2234_s1 }
 0x10d   :  { %v228_v57 = vpop.permute.xlu1 %227  ;;  %v234_v60 = vpop.permute.xlu2 %233 }
 0x10e   :  { %v255_v58 = vmax.f32 %v205_v24, %v228_v57  ;;  %v2412_v0 = vmax.f32 %v208_v36, %v234_v60 }
 0x110   :  { %277 = vrot.lane.b32.xlu2 %v255_v58, %s2234_s1  ;;  %241 = vrot.lane.b32.xlu0 %v2403_v59, %s2233_s28  ;;  %s78_s28 = sshll.u32 %s2970_s8, 4  ;;  %s79_s28 = int_to_ptr.hbm [resolvable:$true] %s78_s28 }
 0x111   :  { %83 = dma.hbm_to_vmem [thread:$0]  %s79_s28, 16384, %s81_s29, [#allocation4 + $0x1] }
 0x115   :  { %v230_v61 = vpop.permute.xlu1 %229 }
 0x116   :  { %v2410_v63 = vmax.f32 %v206_v28, %v230_v61  ;;  %v2118_v61 = vld [vmem:[%s2966_s4 + $0x90] sm:$0xff] }
 0x118   :  { %279 = vrot.lane.b32.xlu1 %v2410_v63, %s2234_s1  ;;  %281 = vrot.lane.b32.xlu2 %v2408_v62, %s2234_s1 }
 0x119   :  { %283 = vrot.lane.b32.xlu0 %v2412_v0, %s2234_s1 }
 0x12d   :  { %v236_v4 = vpop.permute.xlu0 %235 }
 0x12e   :  { %v2429_v5 = vmax.f32 %v209_v40, %v236_v4 }
 0x130   :  { %285 = vrot.lane.b32.xlu1 %v2429_v5, %s2234_s1 }
 0x135   :  { %v238_v6 = vpop.permute.xlu1 %237 }
 0x136   :  { %v2433_v7 = vmax.f32 %v210_v44, %v238_v6 }
 0x138   :  { %287 = vrot.lane.b32.xlu2 %v2433_v7, %s2234_s1 }
 0x13d   :  { %v240_v9 = vpop.permute.xlu1 %239 }
 0x13e   :  { %v2440_v10 = vmax.f32 %v211_v48, %v240_v9 }
 0x140   :  { %289 = vrot.lane.b32.xlu0 %v2440_v10, %s2234_s1 }
 0x15a   :  { %v274_v13 = vpop.permute.xlu2 %273 }
 0x15b   :  { %v2450_v14 = vmax.f32 %v253_v50, %v274_v13 }
 0x15d   :  { %2084 = vmatmul.msk.f32.vlgmr.msra.gmra.mxu2 %vm351_vm11, %v2450_v14  ;;  %v328_v25 = vrot.slane %v2450_v14, 1  ;;  %v467_v26 = vrot.slane %v2450_v14, 2  ;;  %v556_v30 = vrot.slane %v2450_v14, 3 }
 0x16a   :  { %v278_v21 = vpop.permute.xlu2 %277 }
 0x16b   :  { %v2472_v23 = vmax.f32 %v255_v58, %v278_v21  ;;  %v2119_v58 = vld [vmem:[%s2966_s4 + $0x98] sm:$0xff] }
 0x16c   :  { %696 = vmatpush.msrb.mxu2 %v2119_v58 }
 0x16d   :  { %v559_v33 = vrot.slane %v2472_v23, 3  ;;  %v331_v38 = vrot.slane %v2472_v23, 1  ;;  %v470_v39 = vrot.slane %v2472_v23, 2 }
 0x16e   :  { %697 = vmatpush.msrb.mxu2 %v2118_v61 }
 0x172   :  { %v282_v42 = vpop.permute.xlu2 %281 }
 0x173   :  { %v2509_v44 = vmax.f32 %v2408_v62, %v282_v42  ;;  %v2117_v62 = vld [vmem:[%s2966_s4 + $0x88] sm:$0xff] }
 0x174   :  { %698 = vmatpush.msrb.mxu2 %v2117_v62 }
 0x175   :  { %v563_v51 = vrot.slane %v2509_v44, 3  ;;  %v335_v56 = vrot.slane %v2509_v44, 1  ;;  %v474_v57 = vrot.slane %v2509_v44, 2  ;;  %v652_v42 = vrot.slane %v2509_v44, 4 }
 0x17a   :  { %v276_v22 = vpop.permute.xlu0 %275 }
 0x17b   :  { %v2474_v24 = vmax.f32 %v254_v53, %v276_v22 }
 0x17d   :  { %2085 = vmatmul.msk.f32.gmra.mxu2 %vm351_vm11, %v2474_v24  ;;  %v329_v27 = vrot.slane %v2474_v24, 1  ;;  %v468_v28 = vrot.slane %v2474_v24, 2  ;;  %v557_v29 = vrot.slane %v2474_v24, 3 }
 0x17f   :  { %v330_v31 = vsel %vm327_vm12, %v328_v25, %v329_v27  ;;  %v469_v32 = vsel %vm466_vm13, %v467_v26, %v468_v28  ;;  %v2490_v34 = vsel %vm555_vm14, %v556_v30, %v557_v29  ;;  %v2493_v35 = vsel %vm555_vm14, %v557_v29, %v559_v33 }
 0x180   :  { %2076 = vmatmul.msk.f32.vlgmr.msra.gmra.mxu1 %vm351_vm11, %v330_v31  ;;  %2096 = vmatmul.msk.f32.vlgmr.msra.gmra.mxu3 %vm351_vm11, %v469_v32  ;;  %v332_v40 = vsel %vm327_vm12, %v329_v27, %v331_v38  ;;  %v471_v41 = vsel %vm466_vm13, %v468_v28, %v470_v39 }
 0x182   :  { %v242_v36 = vpop.permute.xlu0 %241 }
 0x183   :  { %v2496_v37 = vmax.f32 %v2403_v59, %v242_v36 }
 0x185   :  { %2086 = vmatmul.msk.f32.gmra.mxu2 %vm351_vm11, %v2472_v23  ;;  %291 = vrot.lane.b32.xlu1 %v2496_v37, %s2234_s1 }
 0x188   :  { %2077 = vmatmul.msk.f32.gmra.mxu1 %vm351_vm11, %v332_v40  ;;  %2097 = vmatmul.msk.f32.gmra.mxu3 %vm351_vm11, %v471_v41 }
 0x18a   :  { %v280_v43 = vpop.permute.xlu1 %279 }
 0x18b   :  { %v2512_v45 = vmax.f32 %v2410_v63, %v280_v43  ;;  %v284_v52 = vpop.permute.xlu0 %283  ;;  %v2116_v63 = vld [vmem:[%s2966_s4 + $0x80] sm:$0xff] }
 0x18c   :  { %v2531_v55 = vmax.f32 %v2412_v0, %v284_v52  ;;  %699 = vmatpush.msrb.mxu2 %v2116_v63  ;;  %v2107_v0 = vld [vmem:[%s2966_s4 + $0x78] sm:$0xff] }
 0x18d   :  { %2087 = vmatmul.msk.f32.gmra.mxu2 %vm351_vm11, %v2512_v45  ;;  %v333_v46 = vrot.slane %v2512_v45, 1  ;;  %v472_v47 = vrot.slane %v2512_v45, 2  ;;  %v561_v48 = vrot.slane %v2512_v45, 3  ;;  %607 = vmatpush.msrb.mxu1 %v2107_v0 }
 0x18e   :  { %v337_v6 = vrot.slane %v2531_v55, 1  ;;  %v476_v9 = vrot.slane %v2531_v55, 2  ;;  %v565_v13 = vrot.slane %v2531_v55, 3 }
 0x18f   :  { %v334_v49 = vsel %vm327_vm12, %v331_v38, %v333_v46  ;;  %v473_v50 = vsel %vm466_vm13, %v470_v39, %v472_v47  ;;  %v2525_v53 = vsel %vm555_vm14, %v559_v33, %v561_v48  ;;  %v2528_v54 = vsel %vm555_vm14, %v561_v48, %v563_v51  ;;  %608 = vmatpush.msrb.mxu1 %v2106_v20  ;;  %v2105_v38 = vld [vmem:[%s2966_s4 + $0x68] sm:$0xff] }
 0x190   :  { %2078 = vmatmul.msk.f32.gmra.mxu1 %vm351_vm11, %v334_v49  ;;  %2098 = vmatmul.msk.f32.gmra.mxu3 %vm351_vm11, %v473_v50  ;;  %v336_v59 = vsel %vm327_vm12, %v333_v46, %v335_v56  ;;  %v475_v60 = vsel %vm466_vm13, %v472_v47, %v474_v57  ;;  %v646_v33 = vrot.slane %v2474_v24, 4  ;;  %v648_v39 = vrot.slane %v2472_v23, 4 }
 0x191   :  { %609 = vmatpush.msrb.mxu1 %v2105_v38  ;;  %v650_v24 = vrot.slane %v2512_v45, 4  ;;  %v654_v46 = vrot.slane %v2531_v55, 4 }
 0x192   :  { %v288_v1 = vpop.permute.xlu2 %287  ;;  %v649_v40 = vsel %vm644_vm15, %v646_v33, %v648_v39 }
 0x193   :  { %v2557_v3 = vmax.f32 %v2433_v7, %v288_v1  ;;  %v651_v41 = vsel %vm644_vm15, %v648_v39, %v650_v24  ;;  %v653_v43 = vsel %vm644_vm15, %v650_v24, %v652_v42 }
 0x195   :  { %2088 = vmatmul.msk.f32.gmra.mxu2 %vm351_vm11, %v2531_v55  ;;  %v568_v7 = vrot.slane %v2557_v3, 3  ;;  %v340_v18 = vrot.slane %v2557_v3, 1  ;;  %v479_v19 = vrot.slane %v2557_v3, 2  ;;  %v657_v47 = vrot.slane %v2557_v3, 4 }
 0x198   :  { %2079 = vmatmul.msk.f32.gmra.mxu1 %vm351_vm11, %v336_v59  ;;  %2099 = vmatmul.msk.f32.gmra.mxu3 %vm351_vm11, %v475_v60 }
 0x1a2   :  { %v286_v2 = vpop.permute.xlu1 %285 }
 0x1a3   :  { %v309_v4 = vmax.f32 %v2429_v5, %v286_v2 }
 0x1a5   :  { %2089 = vmatmul.msk.f32.gmra.mxu2 %vm351_vm11, %v309_v4  ;;  %v338_v8 = vrot.slane %v309_v4, 1  ;;  %v477_v11 = vrot.slane %v309_v4, 2  ;;  %v566_v12 = vrot.slane %v309_v4, 3  ;;  %v655_v23 = vrot.slane %v309_v4, 4 }
 0x1a7   :  { %v339_v15 = vsel %vm327_vm12, %v337_v6, %v338_v8  ;;  %v478_v16 = vsel %vm466_vm13, %v476_v9, %v477_v11  ;;  %v2570_v5 = vsel %vm555_vm14, %v565_v13, %v566_v12  ;;  %v2573_v17 = vsel %vm555_vm14, %v566_v12, %v568_v7 }
 0x1a8   :  { %2080 = vmatmul.msk.f32.gmra.mxu1 %vm351_vm11, %v339_v15  ;;  %2100 = vmatmul.msk.f32.gmra.mxu3 %vm351_vm11, %v478_v16  ;;  %v341_v21 = vsel %vm327_vm12, %v338_v8, %v340_v18  ;;  %v480_v22 = vsel %vm466_vm13, %v477_v11, %v479_v19  ;;  %v656_v45 = vsel %vm644_vm15, %v654_v46, %v655_v23 }
 0x1a9   :  { %v658_v48 = vsel %vm644_vm15, %v655_v23, %v657_v47 }
 0x1ad   :  { %2090 = vmatmul.msk.f32.gmra.mxu2 %vm351_vm11, %v2557_v3 }
 0x1b0   :  { %2081 = vmatmul.msk.f32.gmra.mxu1 %vm351_vm11, %v341_v21  ;;  %2101 = vmatmul.msk.f32.gmra.mxu3 %vm351_vm11, %v480_v22 }
 0x1b2   :  { %v290_v25 = vpop.permute.xlu0 %289 }
 0x1b3   :  { %v311_v26 = vmax.f32 %v2440_v10, %v290_v25  ;;  %v645_v10 = vrot.slane %v2450_v14, 4  ;;  %v2104_v14 = vld [vmem:[%s2966_s4 + $0x60] sm:$0xff]  ;;  %s2058_s4 = sld [smem:[#allocation6 + $0x1]] }
 0x1b4   :  { %610 = vmatpush.msrb.mxu1 %v2104_v14 }
 0x1b5   :  { %2091 = vmatmul.msk.f32.gmra.mxu2 %vm351_vm11, %v311_v26  ;;  %v342_v27 = vrot.slane %v311_v26, 1  ;;  %v481_v28 = vrot.slane %v311_v26, 2  ;;  %v570_v29 = vrot.slane %v311_v26, 3  ;;  %v647_v36 = vsel %vm644_vm15, %v645_v10, %v646_v33 }
 0x1b6   :  { %v659_v49 = vrot.slane %v311_v26, 4  ;;  %v2657_v26 = vld [vmem:[%s2967_s5] ss:$0 sm:$0xff] }
 0x1b7   :  { %v343_v30 = vsel %vm327_vm12, %v340_v18, %v342_v27  ;;  %v482_v31 = vsel %vm466_vm13, %v479_v19, %v481_v28  ;;  %v571_v32 = vsel %vm555_vm14, %v568_v7, %v570_v29 }
 0x1b8   :  { %2082 = vmatmul.msk.f32.gmra.mxu1 %vm351_vm11, %v343_v30  ;;  %2102 = vmatmul.msk.f32.gmra.mxu3 %vm351_vm11, %v482_v31  ;;  %v660_v44 = vsel %vm644_vm15, %v657_v47, %v659_v49 }
 0x1b9   :  { %v2660_v33 = vstv %s2058_s4 }
 0x1bd   :  { %2120 = vmatmul.msk.f32.vlgmr.msrb.gmra.mxu2 %vm351_vm11, %v647_v36 }
 0x1c5   :  { %2121 = vmatmul.msk.f32.gmra.mxu2 %vm351_vm11, %v649_v40 }
 0x1cd   :  { %2122 = vmatmul.msk.f32.gmra.mxu2 %vm351_vm11, %v651_v41 }
 0x1d5   :  { %2123 = vmatmul.msk.f32.gmra.mxu2 %vm351_vm11, %v653_v43 }
 0x1dd   :  { %2124 = vmatmul.msk.f32.gmra.mxu2 %vm351_vm11, %v656_v45 }
 0x1e0   :  { %v442_v52 = vpop.f32.mrf.mxu2 }
 0x1e5   :  { %2125 = vmatmul.msk.f32.gmra.mxu2 %vm351_vm11, %v658_v48 }
 0x1ed   :  { %2126 = vmatmul.msk.f32.gmra.mxu2 %vm351_vm11, %v660_v44 }
 0x1f7   :  { %v292_v50 = vpop.permute.xlu1 %291 }
 0x1f8   :  { %v312_v51 = vmax.f32 %v2496_v37, %v292_v50 }
 0x1fa   :  { %v344_v55 = vrot.slane %v312_v51, 1  ;;  %v483_v56 = vrot.slane %v312_v51, 2  ;;  %v661_v57 = vrot.slane %v312_v51, 4  ;;  %v572_v58 = vrot.slane %v312_v51, 3 }
 0x1fc   :  { %v345_v59 = vsel %vm327_vm12, %v342_v27, %v344_v55  ;;  %v484_v60 = vsel %vm466_vm13, %v481_v28, %v483_v56  ;;  %v662_v61 = vsel %vm644_vm15, %v659_v49, %v661_v57  ;;  %v573_v62 = vsel %vm555_vm14, %v570_v29, %v572_v58 }
 0x1fd   :  { %v385_v63 = vpop.f32.mrf.mxu1  ;;  %2083 = vmatmul.msk.f32.gmra.mxu1 %vm351_vm11, %v345_v59  ;;  %2103 = vmatmul.msk.f32.gmra.mxu3 %vm351_vm11, %v484_v60  ;;  %vm801_vm12 = vcmask 517120   ;;  %vm830_vm15 = vcmask 1041920  }
 0x1fe   :  { %v443_v0 = vadd.f32 %v442_v52, %v385_v63  ;;  %2127 = vmatmul.msk.f32.gmra.mxu2 %vm351_vm11, %v662_v61 }
 0x200   :  { %v445_v37 = vpop.f32.mrf.mxu2 }
 0x203   :  { %v523_v15 = vpop.f32.mrf.mxu3 }
 0x204   :  { %v547_v19 = vadd.f32 %v523_v15, %v443_v0 }
 0x205   :  { %v388_v1 = vpop.f32.mrf.mxu1  ;;  %2108 = vmatmul.msk.f32.vlgmr.msrb.gmra.mxu1 %vm351_vm11, %v2490_v34 }
 0x206   :  { %v446_v2 = vadd.f32 %v445_v37, %v388_v1 }
 0x208   :  { %v448_v3 = vpop.f32.mrf.mxu2 }
 0x20b   :  { %v526_v7 = vpop.f32.mrf.mxu3 }
 0x20c   :  { %v548_v27 = vadd.f32 %v526_v7, %v446_v2 }
 0x20d   :  { %v391_v4 = vpop.f32.mrf.mxu1  ;;  %2109 = vmatmul.msk.f32.gmra.mxu1 %vm351_vm11, %v2493_v35 }
 0x20e   :  { %v449_v6 = vadd.f32 %v448_v3, %v391_v4 }
 0x210   :  { %v451_v8 = vpop.f32.mrf.mxu2 }
 0x213   :  { %v529_v18 = vpop.f32.mrf.mxu3 }
 0x214   :  { %v549_v39 = vadd.f32 %v529_v18, %v449_v6 }
 0x215   :  { %v394_v9 = vpop.f32.mrf.mxu1  ;;  %2110 = vmatmul.msk.f32.gmra.mxu1 %vm351_vm11, %v2525_v53 }
 0x216   :  { %v452_v11 = vadd.f32 %v451_v8, %v394_v9 }
 0x218   :  { %v454_v34 = vpop.f32.mrf.mxu2 }
 0x21b   :  { %v532_v28 = vpop.f32.mrf.mxu3 }
 0x21c   :  { %v550_v55 = vadd.f32 %v532_v28, %v452_v11 }
 0x21d   :  { %2111 = vmatmul.msk.f32.gmra.mxu1 %vm351_vm11, %v2528_v54 }
 0x225   :  { %2112 = vmatmul.msk.f32.gmra.mxu1 %vm351_vm11, %v2570_v5  ;;  %v397_v12 = vpop.f32.mrf.mxu1 }
 0x226   :  { %v455_v56 = vadd.f32 %v454_v34, %v397_v12 }
 0x228   :  { %v2642_v35 = vpop.f32.mrf.mxu2 }
 0x22b   :  { %v535_v40 = vpop.f32.mrf.mxu3 }
 0x22c   :  { %v551_v0 = vadd.f32 %v535_v40, %v455_v56 }
 0x22d   :  { %2113 = vmatmul.msk.f32.gmra.mxu1 %vm351_vm11, %v2573_v17  ;;  %v2646_v53 = vpop.f32.mrf.mxu1 }
 0x22e   :  { %v458_v15 = vadd.f32 %v2642_v35, %v2646_v53 }
 0x230   :  { %v2644_v13 = vpop.f32.mrf.mxu2 }
 0x233   :  { %v538_v50 = vpop.f32.mrf.mxu3 }
 0x235   :  { %2114 = vmatmul.msk.f32.gmra.mxu1 %vm351_vm11, %v571_v32  ;;  %v2650_v16 = vpop.f32.mrf.mxu1 }
 0x236   :  { %v461_v28 = vadd.f32 %v2644_v13, %v2650_v16 }
 0x238   :  { %v2648_v54 = vpop.f32.mrf.mxu2 }
 0x23b   :  { %v541_v11 = vpop.f32.mrf.mxu3 }
 0x23c   :  { %v553_v16 = vadd.f32 %v541_v11, %v461_v28 }
 0x23d   :  { %2115 = vmatmul.msk.f32.gmra.mxu1 %vm351_vm11, %v573_v62  ;;  %vm798_vm11 = vcmask 1047559  }
 0x240   :  { %v701_v5 = vpop.f32.mrf.mxu2 }
 0x248   :  { %v704_v20 = vpop.f32.mrf.mxu2 }
 0x250   :  { %v707_v31 = vpop.f32.mrf.mxu2 }
 0x258   :  { %v710_v43 = vpop.f32.mrf.mxu2 }
 0x260   :  { %v713_v63 = vpop.f32.mrf.mxu2 }
 0x27a   :  { %v2652_v17 = vpop.f32.mrf.mxu1 }
 0x282   :  { %v612_v21 = vpop.f32.mrf.mxu1 }
 0x283   :  { %v636_v22 = vadd.f32 %v612_v21, %v547_v19 }
 0x285   :  { %v725_v25 = vadd.f32 %v701_v5, %v636_v22 }
 0x287   :  { %v737_v32 = vadd.f32 %v2657_v26, %v725_v25 }
 0x289   :  { %v754_v36 = vmul.f32 %v2660_v33, %v737_v32  ;;  %vm745_vm0 = vcmp.ge.f32.partialorder %v737_v32, 0.0 }
 0x28a   :  { %v615_v29 = vpop.f32.mrf.mxu1 }
 0x28b   :  { %v637_v30 = vadd.f32 %v615_v29, %v548_v27  ;;  %v762_v14 = vsel %vm745_vm0, %v737_v32, %v754_v36  ;;  %v552_v27 = vadd.f32 %v538_v50, %v458_v15 }
 0x28c   :  { %v771_v46 = vsel %vm770_vm1, %v762_v14, -inf  ;;  %v804_v45 = vsel %vm803_vm2, %v762_v14, -inf  ;;  %v544_v14 = vpop.f32.mrf.mxu3 }
 0x28d   :  { %v726_v10 = vadd.f32 %v704_v20, %v637_v30  ;;  %v772_v48 = vrot.slane %v771_v46, 4  ;;  %v805_v51 = vrot.slane %v804_v45, 4  ;;  %v716_v30 = vpop.f32.mrf.mxu2 }
 0x28f   :  { %v738_v38 = vadd.f32 %v2657_v26, %v726_v10  ;;  %v773_v57 = vmax.f32 %v771_v46, %v772_v48  ;;  %v806_v60 = vmax.f32 %v804_v45, %v805_v51  ;;  %v464_v46 = vadd.f32 %v2648_v54, %v2652_v17 }
 0x291   :  { %v755_v42 = vmul.f32 %v2660_v33, %v738_v38  ;;  %vm746_vm3 = vcmp.ge.f32.partialorder %v738_v38, 0.0  ;;  %v774_v37 = vrot.slane %v773_v57, 2  ;;  %v807_v6 = vrot.slane %v806_v60, 2 }
 0x292   :  { %v618_v24 = vpop.f32.mrf.mxu1 }
 0x293   :  { %v638_v41 = vadd.f32 %v618_v24, %v549_v39  ;;  %v763_v47 = vsel %vm746_vm3, %v738_v38, %v755_v42  ;;  %v775_v7 = vmax.f32 %v773_v57, %v774_v37  ;;  %v808_v19 = vmax.f32 %v806_v60, %v807_v6 }
 0x294   :  { %v832_v52 = vsel %vm770_vm1, %v763_v47, -inf  ;;  %v857_v61 = vsel %vm803_vm2, %v763_v47, -inf }
 0x295   :  { %v727_v23 = vadd.f32 %v707_v31, %v638_v41  ;;  %v833_v58 = vrot.slane %v832_v52, 4  ;;  %v858_v2 = vrot.slane %v857_v61, 4  ;;  %v776_v35 = vrot.slane %v775_v7, 1 }
 0x296   :  { %v809_v40 = vrot.slane %v808_v19, 1 }
 0x297   :  { %v739_v49 = vadd.f32 %v2657_v26, %v727_v23  ;;  %v834_v1 = vmax.f32 %v832_v52, %v833_v58  ;;  %v859_v18 = vmax.f32 %v857_v61, %v858_v2  ;;  %v554_v52 = vadd.f32 %v544_v14, %v464_v46 }
 0x298   :  { %v810_v57 = vmax.f32 %v808_v19, %v809_v40 }
 0x299   :  { %v756_v59 = vmul.f32 %v2660_v33, %v739_v49  ;;  %vm747_vm4 = vcmp.ge.f32.partialorder %v739_v49, 0.0  ;;  %v835_v5 = vrot.slane %v834_v1, 2  ;;  %v860_v31 = vrot.slane %v859_v18, 2 }
 0x29a   :  { %v621_v44 = vpop.f32.mrf.mxu1 }
 0x29b   :  { %v639_v62 = vadd.f32 %v621_v44, %v550_v55  ;;  %v764_v3 = vsel %vm747_vm4, %v739_v49, %v756_v59  ;;  %v836_v53 = vmax.f32 %v834_v1, %v835_v5  ;;  %v861_v47 = vmax.f32 %v859_v18, %v860_v31 }
 0x29c   :  { %v884_v34 = vsel %vm770_vm1, %v764_v3, -inf  ;;  %v909_v20 = vsel %vm803_vm2, %v764_v3, -inf  ;;  %v777_v55 = vmax.f32 %v775_v7, %v776_v35  ;;  %v719_v3 = vpop.f32.mrf.mxu2 }
 0x29d   :  { %v728_v8 = vadd.f32 %v710_v43, %v639_v62  ;;  %v885_v25 = vrot.slane %v884_v34, 4  ;;  %v910_v32 = vrot.slane %v909_v20, 4  ;;  %v837_v45 = vrot.slane %v836_v53, 1 }
 0x29f   :  { %v740_v21 = vadd.f32 %v2657_v26, %v728_v8  ;;  %v886_v24 = vmax.f32 %v884_v34, %v885_v25  ;;  %v911_v48 = vmax.f32 %v909_v20, %v910_v32  ;;  %v2687_v61 = vmax.f32 %v836_v53, %v837_v45 }
 0x2a1   :  { %v757_v36 = vmul.f32 %v2660_v33, %v740_v21  ;;  %vm748_vm6 = vcmp.ge.f32.partialorder %v740_v21, 0.0  ;;  %v887_v56 = vrot.slane %v886_v24, 2  ;;  %v912_v54 = vrot.slane %v911_v48, 2 }
 0x2a2   :  { %v624_v4 = vpop.f32.mrf.mxu1 }
 0x2a3   :  { %v640_v9 = vadd.f32 %v624_v4, %v551_v0  ;;  %v765_v49 = vsel %vm748_vm6, %v740_v21, %v757_v36  ;;  %v2690_v4 = vmax.f32 %v886_v24, %v887_v56  ;;  %v2695_v7 = vmax.f32 %v911_v48, %v912_v54 }
 0x2a4   :  { %v936_v17 = vsel %vm770_vm1, %v765_v49, -inf  ;;  %v961_v6 = vsel %vm803_vm2, %v765_v49, -inf }
 0x2a5   :  { %v729_v12 = vadd.f32 %v713_v63, %v640_v9  ;;  %v862_v63 = vrot.slane %v861_v47, 1  ;;  %v937_v5 = vrot.slane %v936_v17, 4  ;;  %v889_v25 = vrot.slane %v2690_v4, 1 }
 0x2a6   :  { %v914_v36 = vrot.slane %v2695_v7, 1 }
 0x2a7   :  { %v741_v22 = vadd.f32 %v2657_v26, %v729_v12  ;;  %v938_v31 = vmax.f32 %v936_v17, %v937_v5 }
 0x2a9   :  { %vm749_vm5 = vcmp.ge.f32.partialorder %v741_v22, 0.0  ;;  %v758_v29 = vmul.f32 %v2660_v33, %v741_v22 }
 0x2aa   :  { %v627_v10 = vpop.f32.mrf.mxu1 }
 0x2ab   :  { %v766_v38 = vsel %vm749_vm5, %v741_v22, %v758_v29  ;;  %v641_v39 = vadd.f32 %v627_v10, %v552_v27  ;;  %v863_v22 = vmax.f32 %v861_v47, %v862_v63  ;;  %v962_v27 = vrot.slane %v961_v6, 4 }
 0x2ac   :  { %v778_v41 = vsel %vm770_vm1, %v766_v38, -inf  ;;  %v811_v13 = vsel %vm803_vm2, %v766_v38, -inf  ;;  %v939_v63 = vrot.slane %v938_v31, 2 }
 0x2ad   :  { %v779_v42 = vrot.slane %v778_v41, 4  ;;  %v812_v43 = vrot.slane %v811_v13, 4  ;;  %v730_v23 = vadd.f32 %v716_v30, %v641_v39  ;;  %v963_v48 = vmax.f32 %v961_v6, %v962_v27 }
 0x2af   :  { %v780_v44 = vmax.f32 %v778_v41, %v779_v42  ;;  %v813_v50 = vmax.f32 %v811_v13, %v812_v43  ;;  %v742_v51 = vadd.f32 %v2657_v26, %v730_v23  ;;  %v722_v13 = vpop.f32.mrf.mxu2 }
 0x2b1   :  { %v781_v58 = vrot.slane %v780_v44, 2  ;;  %v814_v59 = vrot.slane %v813_v50, 2  ;;  %vm750_vm7 = vcmp.ge.f32.partialorder %v742_v51, 0.0  ;;  %v759_v60 = vmul.f32 %v2660_v33, %v742_v51 }
 0x2b2   :  { %v630_v62 = vpop.f32.mrf.mxu1 }
 0x2b3   :  { %v782_v0 = vmax.f32 %v780_v44, %v781_v58  ;;  %v767_v37 = vsel %vm750_vm7, %v742_v51, %v759_v60  ;;  %v642_v1 = vadd.f32 %v630_v62, %v553_v16  ;;  %v815_v2 = vmax.f32 %v813_v50, %v814_v59 }
 0x2b4   :  { %v839_v8 = vsel %vm770_vm1, %v767_v37, -inf  ;;  %v864_v9 = vsel %vm803_vm2, %v767_v37, -inf }
 0x2b5   :  { %v783_v11 = vrot.slane %v782_v0, 1  ;;  %v840_v34 = vrot.slane %v839_v8, 4  ;;  %v865_v12 = vrot.slane %v864_v9, 4  ;;  %v731_v15 = vadd.f32 %v719_v3, %v642_v1 }
 0x2b6   :  { %v816_v18 = vrot.slane %v815_v2, 1  ;;  %v964_v1 = vrot.slane %v963_v48, 2 }
 0x2b7   :  { %v841_v19 = vmax.f32 %v839_v8, %v840_v34  ;;  %v866_v20 = vmax.f32 %v864_v9, %v865_v12  ;;  %v743_v21 = vadd.f32 %v2657_v26, %v731_v15  ;;  %v784_v29 = vmax.f32 %v782_v0, %v783_v11 }
 0x2b8   :  { %v817_v28 = vmax.f32 %v815_v2, %v816_v18  ;;  %v940_v18 = vmax.f32 %v938_v31, %v939_v63 }
 0x2b9   :  { %v842_v30 = vrot.slane %v841_v19, 2  ;;  %v867_v35 = vrot.slane %v866_v20, 2  ;;  %vm751_vm13 = vcmp.ge.f32.partialorder %v743_v21, 0.0  ;;  %v760_v53 = vmul.f32 %v2660_v33, %v743_v21 }
 0x2ba   :  { %v633_v32 = vpop.f32.mrf.mxu1  ;;  %v822_v10 = vrot.slane %v817_v28, 7  ;;  %v791_v38 = vrot.slane %v784_v29, 7  ;;  %v965_v29 = vmax.f32 %v963_v48, %v964_v1 }
 0x2bb   :  { %v843_v39 = vmax.f32 %v841_v19, %v842_v30  ;;  %v768_v40 = vsel %vm751_vm13, %v743_v21, %v760_v53  ;;  %v643_v24 = vadd.f32 %v633_v32, %v554_v52  ;;  %v868_v41 = vmax.f32 %v866_v20, %v867_v35 }
 0x2bc   :  { %v891_v16 = vsel %vm770_vm1, %v768_v40, -inf  ;;  %v916_v14 = vsel %vm803_vm2, %v768_v40, -inf  ;;  %v823_v42 = vsel %vm792_vm8, %v822_v10, %v810_v57  ;;  %v793_v43 = vsel %vm792_vm8, %v791_v38, %v777_v55 }
 0x2bd   :  { %v844_v23 = vrot.slane %v843_v39, 1  ;;  %v892_v46 = vrot.slane %v891_v16, 4  ;;  %v917_v45 = vrot.slane %v916_v14, 4  ;;  %v732_v47 = vadd.f32 %v722_v13, %v643_v24 }
 0x2be   :  { %v824_v49 = vsel %vm794_vm9, %v822_v10, %v823_v42  ;;  %v869_v44 = vrot.slane %v868_v41, 1  ;;  %v795_v50 = vsel %vm794_vm9, %v791_v38, %v793_v43  ;;  %v941_v13 = vrot.slane %v940_v18, 1 }
 0x2bf   :  { %v893_v51 = vmax.f32 %v891_v16, %v892_v46  ;;  %v918_v52 = vmax.f32 %v916_v14, %v917_v45  ;;  %v744_v56 = vadd.f32 %v2657_v26, %v732_v47  ;;  %v825_v58 = vsel %vm796_vm10, %v822_v10, %v824_v49 }
 0x2c0   :  { %v826_v57 = vsel %vm798_vm11, %v822_v10, %v825_v58  ;;  %v870_v59 = vmax.f32 %v868_v41, %v869_v44  ;;  %v797_v55 = vsel %vm796_vm10, %v791_v38, %v795_v50  ;;  %v845_v60 = vmax.f32 %v843_v39, %v844_v23 }
 0x2c1   :  { %v894_v54 = vrot.slane %v893_v51, 2  ;;  %v919_v17 = vrot.slane %v918_v52, 2  ;;  %vm752_vm14 = vcmp.ge.f32.partialorder %v744_v56, 0.0  ;;  %v761_v62 = vmul.f32 %v2660_v33, %v744_v56  ;;  %827 = vrot.lane.b32.xlu2 %v826_v57, %s2234_s1 }
 0x2c2   :  { %v875_v0 = vrot.slane %v870_v59, 7  ;;  %v799_v37 = vsel %vm798_vm11, %v791_v38, %v797_v55  ;;  %v850_v26 = vrot.slane %v845_v60, 7  ;;  %v890_v10 = vmax.f32 %v2690_v4, %v889_v25 }
 0x2c3   :  { %v895_v2 = vmax.f32 %v893_v51, %v894_v54  ;;  %v769_v3 = vsel %vm752_vm14, %v744_v56, %v761_v62  ;;  %v920_v6 = vmax.f32 %v918_v52, %v919_v17  ;;  %802 = vst.msk [vmem:[#allocation5] sm:$0x3] %vm801_vm12, %v799_v37  ;;  %v915_v38 = vmax.f32 %v2695_v7, %v914_v36 }
 0x2c4   :  { %v943_v33 = vsel %vm770_vm1, %v769_v3, -inf  ;;  %v968_v8 = vsel %vm803_vm2, %v769_v3, -inf  ;;  %v876_v9 = vsel %vm792_vm8, %v875_v0, %v863_v22  ;;  %v851_v11 = vsel %vm792_vm8, %v850_v26, %v2687_v61 }
 0x2c5   :  { %v896_v34 = vrot.slane %v895_v2, 1  ;;  %v944_v12 = vrot.slane %v943_v33, 4  ;;  %v969_v15 = vrot.slane %v968_v8, 4  ;;  %v877_v5 = vsel %vm794_vm9, %v875_v0, %v876_v9 }
 0x2c6   :  { %v878_v19 = vsel %vm796_vm10, %v875_v0, %v877_v5  ;;  %v921_v20 = vrot.slane %v920_v6, 1  ;;  %v852_v21 = vsel %vm794_vm9, %v850_v26, %v851_v11  ;;  %v966_v14 = vrot.slane %v965_v29, 1 }
 0x2c7   :  { %v945_v22 = vmax.f32 %v943_v33, %v944_v12  ;;  %v970_v61 = vmax.f32 %v968_v8, %v969_v15  ;;  %v879_v27 = vsel %vm798_vm11, %v875_v0, %v878_v19  ;;  %v853_v28 = vsel %vm796_vm10, %v850_v26, %v852_v21 }
 0x2c8   :  { %880 = vrot.lane.b32.xlu0 %v879_v27, %s2234_s1  ;;  %v922_v30 = vmax.f32 %v920_v6, %v921_v20  ;;  %v854_v35 = vsel %vm798_vm11, %v850_v26, %v853_v28  ;;  %v897_v53 = vmax.f32 %v895_v2, %v896_v34  ;;  %v942_v49 = vmax.f32 %v940_v18, %v941_v13 }
 0x2c9   :  { %v946_v31 = vrot.slane %v945_v22, 2  ;;  %v971_v32 = vrot.slane %v970_v61, 2  ;;  %856 = vst.msk [vmem:[#allocation5 + $0x2] sm:$0x3] %vm801_vm12, %v854_v35  ;;  %v967_v44 = vmax.f32 %v965_v29, %v966_v14 }
 0x2ca   :  { %v927_v39 = vrot.slane %v922_v30, 7  ;;  %v902_v40 = vrot.slane %v897_v53, 7 }
 0x2cb   :  { %v947_v24 = vmax.f32 %v945_v22, %v946_v31  ;;  %v972_v41 = vmax.f32 %v970_v61, %v971_v32 }
 0x2cc   :  { %v928_v16 = vsel %vm792_vm8, %v927_v39, %v915_v38  ;;  %v903_v42 = vsel %vm792_vm8, %v902_v40, %v890_v10 }
 0x2cd   :  { %v948_v43 = vrot.slane %v947_v24, 1  ;;  %v929_v23 = vsel %vm794_vm9, %v927_v39, %v928_v16  ;;  %v973_v46 = vrot.slane %v972_v41, 1  ;;  %v904_v4 = vsel %vm794_vm9, %v902_v40, %v903_v42 }
 0x2ce   :  { %v930_v25 = vsel %vm796_vm10, %v927_v39, %v929_v23  ;;  %v905_v7 = vsel %vm796_vm10, %v902_v40, %v904_v4 }
 0x2cf   :  { %v931_v36 = vsel %vm798_vm11, %v927_v39, %v930_v25  ;;  %v974_v45 = vmax.f32 %v972_v41, %v973_v46  ;;  %v949_v47 = vmax.f32 %v947_v24, %v948_v43  ;;  %v906_v48 = vsel %vm798_vm11, %v902_v40, %v905_v7 }
 0x2d0   :  { %932 = vrot.lane.b32.xlu1 %v931_v36, %s2234_s1  ;;  %908 = vst.msk [vmem:[#allocation5 + $0x4] sm:$0x3] %vm801_vm12, %v906_v48 }
 0x2d1   :  { %v979_v50 = vrot.slane %v974_v45, 7  ;;  %v954_v51 = vrot.slane %v949_v47, 7 }
 0x2d3   :  { %v980_v52 = vsel %vm792_vm8, %v979_v50, %v967_v44  ;;  %v955_v56 = vsel %vm792_vm8, %v954_v51, %v942_v49 }
 0x2d4   :  { %v981_v58 = vsel %vm794_vm9, %v979_v50, %v980_v52  ;;  %v956_v57 = vsel %vm794_vm9, %v954_v51, %v955_v56 }
 0x2d5   :  { %v982_v59 = vsel %vm796_vm10, %v979_v50, %v981_v58  ;;  %v957_v55 = vsel %vm796_vm10, %v954_v51, %v956_v57 }
 0x2d6   :  { %v983_v60 = vsel %vm798_vm11, %v979_v50, %v982_v59  ;;  %v958_v54 = vsel %vm798_vm11, %v954_v51, %v957_v55 }
 0x2d7   :  { %984 = vrot.lane.b32.xlu2 %v983_v60, %s2234_s1  ;;  %960 = vst.msk [vmem:[#allocation5 + $0x6] sm:$0x3] %vm801_vm12, %v958_v54 }
 0x31b   :  { %v828_v17 = vpop.permute.xlu2 %827 }
 0x31c   :  { %831 = vst.msk [vmem:[#allocation5] sm:$0x3] %vm830_vm15, %v828_v17 }
 0x331   :  { %v985_v62 = vpop.permute.xlu2 %984 }
 0x332   :  { %987 = vst.msk [vmem:[#allocation5 + $0x6] sm:$0x3] %vm830_vm15, %v985_v62 }
 0x33a   :  { %v881_v63 = vpop.permute.xlu0 %880 }
 0x33b   :  { %883 = vst.msk [vmem:[#allocation5 + $0x2] sm:$0x3] %vm830_vm15, %v881_v63 }
 0x342   :  { %v933_v0 = vpop.permute.xlu1 %932 }
 0x343   :  { %935 = vst.msk [vmem:[#allocation5 + $0x4] sm:$0x3] %vm830_vm15, %v933_v0 }
 0x344   :  { %2226 = dma.done.wait [#allocation4], 32768 }
 0x345   :  { %2227 = vsyncadd [#allocation4], 4294934528  ;;  %v1053_v37 = vld [vmem:[#allocation2 + $0x1e0] sm:$0xff]  ;;  %v1118_v24 = vld [vmem:[#allocation2 + $0x3e8] sm:$0xff] }
 0x346   :  { %v1049_v26 = vld [vmem:[#allocation2 + $0x1c0] sm:$0xff]  ;;  %1269 = vmatpush.msrb.mxu3 %v1053_v37  ;;  %1369 = vmatpush.msra.mxu2 %v1118_v24  ;;  %v1114_v42 = vld [vmem:[#allocation2 + $0x3c8] sm:$0xff] }
 0x347   :  { %v1117_v1 = vld [vmem:[#allocation2 + $0x3e0] sm:$0xff]  ;;  %v1054_v4 = vld [vmem:[#allocation2 + $0x1e8] sm:$0xff] }
 0x348   :  { %v1045_v2 = vld [vmem:[#allocation2 + $0x1a0] sm:$0xff]  ;;  %1289 = vmatpush.msrb.mxu0 %v1117_v1  ;;  %1270 = vmatpush.msrb.mxu3 %v1049_v26  ;;  %v1110_v7 = vld [vmem:[#allocation2 + $0x3a8] sm:$0xff] }
 0x349   :  { %v1113_v3 = vld [vmem:[#allocation2 + $0x3c0] sm:$0xff]  ;;  %1370 = vmatpush.msra.mxu2 %v1114_v42  ;;  %v1050_v45 = vld [vmem:[#allocation2 + $0x1c8] sm:$0xff]  ;;  %1349 = vmatpush.msra.mxu1 %v1054_v4  ;;  %v1119_v4 = vld [vmem:[#allocation2 + $0x3f0] sm:$0xff] }
 0x34a   :  { %v1109_v6 = vld [vmem:[#allocation2 + $0x3a0] sm:$0xff]  ;;  %1290 = vmatpush.msrb.mxu0 %v1113_v3  ;;  %1271 = vmatpush.msrb.mxu3 %v1045_v2  ;;  %v1106_v48 = vld [vmem:[#allocation2 + $0x388] sm:$0xff] }
 0x34b   :  { %v1041_v33 = vld [vmem:[#allocation2 + $0x180] sm:$0xff]  ;;  %1371 = vmatpush.msra.mxu2 %v1110_v7  ;;  %v1046_v44 = vld [vmem:[#allocation2 + $0x1a8] sm:$0xff]  ;;  %1350 = vmatpush.msra.mxu1 %v1050_v45  ;;  %v1115_v45 = vld [vmem:[#allocation2 + $0x3d0] sm:$0xff] }
 0x34c   :  { %v1105_v8 = vld [vmem:[#allocation2 + $0x380] sm:$0xff]  ;;  %1291 = vmatpush.msrb.mxu0 %v1109_v6  ;;  %1272 = vmatpush.msrb.mxu3 %v1041_v33  ;;  %v1102_v51 = vld [vmem:[#allocation2 + $0x368] sm:$0xff] }
 0x34d   :  { %v1037_v9 = vld [vmem:[#allocation2 + $0x160] sm:$0xff]  ;;  %1372 = vmatpush.msra.mxu2 %v1106_v48  ;;  %v1042_v56 = vld [vmem:[#allocation2 + $0x188] sm:$0xff]  ;;  %1351 = vmatpush.msra.mxu1 %v1046_v44  ;;  %v1055_v44 = vld [vmem:[#allocation2 + $0x1f0] sm:$0xff] }
 0x34e   :  { %v1101_v11 = vld [vmem:[#allocation2 + $0x360] sm:$0xff]  ;;  %1292 = vmatpush.msrb.mxu0 %v1105_v8  ;;  %1273 = vmatpush.msrb.mxu3 %v1037_v9  ;;  %v1098_v57 = vld [vmem:[#allocation2 + $0x348] sm:$0xff] }
 0x34f   :  { %v1033_v34 = vld [vmem:[#allocation2 + $0x140] sm:$0xff]  ;;  %1373 = vmatpush.msra.mxu2 %v1102_v51  ;;  %v1038_v55 = vld [vmem:[#allocation2 + $0x168] sm:$0xff]  ;;  %1352 = vmatpush.msra.mxu1 %v1042_v56  ;;  %v1111_v51 = vld [vmem:[#allocation2 + $0x3b0] sm:$0xff] }
 0x350   :  { %v1097_v12 = vld [vmem:[#allocation2 + $0x340] sm:$0xff]  ;;  %1293 = vmatpush.msrb.mxu0 %v1101_v11  ;;  %1274 = vmatpush.msrb.mxu3 %v1033_v34  ;;  %v1094_v54 = vld [vmem:[#allocation2 + $0x328] sm:$0xff]  ;;  %v1051_v56 = vld [vmem:[#allocation2 + $0x1d0] sm:$0xff] }
 0x351   :  { %v1029_v15 = vld [vmem:[#allocation2 + $0x120] sm:$0xff]  ;;  %1374 = vmatpush.msra.mxu2 %v1098_v57  ;;  %v1034_v62 = vld [vmem:[#allocation2 + $0x148] sm:$0xff]  ;;  %1353 = vmatpush.msra.mxu1 %v1038_v55  ;;  %v1107_v57 = vld [vmem:[#allocation2 + $0x390] sm:$0xff] }
 0x352   :  { %v1093_v5 = vld [vmem:[#allocation2 + $0x320] sm:$0xff]  ;;  %1294 = vmatpush.msrb.mxu0 %v1097_v12  ;;  %1275 = vmatpush.msrb.mxu3 %v1029_v15  ;;  %v1090_v0 = vld [vmem:[#allocation2 + $0x308] sm:$0xff]  ;;  %v1047_v55 = vld [vmem:[#allocation2 + $0x1b0] sm:$0xff] }
 0x353   :  { %v1025_v18 = vld [vmem:[#allocation2 + $0x100] sm:$0xff]  ;;  %1375 = vmatpush.msra.mxu2 %v1094_v54  ;;  %v1030_v26 = vld [vmem:[#allocation2 + $0x128] sm:$0xff]  ;;  %1354 = vmatpush.msra.mxu1 %v1034_v62  ;;  %v1103_v54 = vld [vmem:[#allocation2 + $0x370] sm:$0xff] }
 0x354   :  { %v1089_v19 = vld [vmem:[#allocation2 + $0x300] sm:$0xff]  ;;  %1295 = vmatpush.msrb.mxu0 %v1093_v5  ;;  %1276 = vmatpush.msrb.mxu3 %v1025_v18  ;;  %v1086_v2 = vld [vmem:[#allocation2 + $0x2e8] sm:$0xff]  ;;  %v1043_v62 = vld [vmem:[#allocation2 + $0x190] sm:$0xff] }
 0x355   :  { %v1021_v20 = vld [vmem:[#allocation2 + $0xe0] sm:$0xff]  ;;  %1376 = vmatpush.msra.mxu2 %v1090_v0  ;;  %v1026_v6 = vld [vmem:[#allocation2 + $0x108] sm:$0xff]  ;;  %1355 = vmatpush.msra.mxu1 %v1030_v26  ;;  %v1099_v0 = vld [vmem:[#allocation2 + $0x350] sm:$0xff] }
 0x356   :  { %v1085_v21 = vld [vmem:[#allocation2 + $0x2e0] sm:$0xff]  ;;  %1296 = vmatpush.msrb.mxu0 %v1089_v19  ;;  %1277 = vmatpush.msrb.mxu3 %v1021_v20  ;;  %v1082_v8 = vld [vmem:[#allocation2 + $0x2c8] sm:$0xff]  ;;  %v1039_v26 = vld [vmem:[#allocation2 + $0x170] sm:$0xff] }
 0x357   :  { %v1017_v22 = vld [vmem:[#allocation2 + $0xc0] sm:$0xff]  ;;  %1377 = vmatpush.msra.mxu2 %v1086_v2  ;;  %v1022_v11 = vld [vmem:[#allocation2 + $0xe8] sm:$0xff]  ;;  %1356 = vmatpush.msra.mxu1 %v1026_v6  ;;  %v1095_v2 = vld [vmem:[#allocation2 + $0x330] sm:$0xff] }
 0x358   :  { %v992_v61 = vld [vmem:[#allocation5] sm:$0xff]  ;;  %1297 = vmatpush.msrb.mxu0 %v1085_v21  ;;  %1278 = vmatpush.msrb.mxu3 %v1017_v22  ;;  %v1078_v12 = vld [vmem:[#allocation2 + $0x2a8] sm:$0xff]  ;;  %v1035_v6 = vld [vmem:[#allocation2 + $0x150] sm:$0xff] }
 0x359   :  { %v1081_v27 = vld [vmem:[#allocation2 + $0x2c0] sm:$0xff]  ;;  %1260 = vst [vmem:[#allocation1] ss:$4 sm:$0xff] %v992_v61  ;;  %1378 = vmatpush.msra.mxu2 %v1082_v8  ;;  %v1018_v5 = vld [vmem:[#allocation2 + $0xc8] sm:$0xff]  ;;  %1357 = vmatpush.msra.mxu1 %v1022_v11  ;;  %v1091_v8 = vld [vmem:[#allocation2 + $0x310] sm:$0xff] }
 0x35a   :  { %v1013_v28 = vld [vmem:[#allocation2 + $0xa0] sm:$0xff]  ;;  %1298 = vmatpush.msrb.mxu0 %v1081_v27  ;;  %v1074_v19 = vld [vmem:[#allocation2 + $0x288] sm:$0xff]  ;;  %v1031_v11 = vld [vmem:[#allocation2 + $0x130] sm:$0xff] }
 0x35b   :  { %v1077_v29 = vld [vmem:[#allocation2 + $0x2a0] sm:$0xff]  ;;  %1279 = vmatpush.msrb.mxu3 %v1013_v28  ;;  %1379 = vmatpush.msra.mxu2 %v1078_v12  ;;  %v1014_v21 = vld [vmem:[#allocation2 + $0xa8] sm:$0xff]  ;;  %v1087_v12 = vld [vmem:[#allocation2 + $0x2f0] sm:$0xff] }
 0x35c   :  { %v1009_v30 = vld [vmem:[#allocation2 + $0x80] sm:$0xff]  ;;  %1299 = vmatpush.msrb.mxu0 %v1077_v29  ;;  %1358 = vmatpush.msra.mxu1 %v1018_v5  ;;  %v1070_v61 = vld [vmem:[#allocation2 + $0x268] sm:$0xff]  ;;  %v1027_v5 = vld [vmem:[#allocation2 + $0x110] sm:$0xff] }
 0x35d   :  { %v1073_v35 = vld [vmem:[#allocation2 + $0x280] sm:$0xff]  ;;  %1280 = vmatpush.msrb.mxu3 %v1009_v30  ;;  %1380 = vmatpush.msra.mxu2 %v1074_v19  ;;  %v1010_v28 = vld [vmem:[#allocation2 + $0x88] sm:$0xff]  ;;  %v1083_v19 = vld [vmem:[#allocation2 + $0x2d0] sm:$0xff] }
 0x35e   :  { %v1005_v53 = vld [vmem:[#allocation2 + $0x60] sm:$0xff]  ;;  %1300 = vmatpush.msrb.mxu0 %v1073_v35  ;;  %1359 = vmatpush.msra.mxu1 %v1014_v21  ;;  %v1066_v30 = vld [vmem:[#allocation2 + $0x248] sm:$0xff]  ;;  %v1023_v21 = vld [vmem:[#allocation2 + $0xf0] sm:$0xff] }
 0x35f   :  { %v1069_v31 = vld [vmem:[#allocation2 + $0x260] sm:$0xff]  ;;  %1281 = vmatpush.msrb.mxu3 %v1005_v53  ;;  %1381 = vmatpush.msra.mxu2 %v1070_v61  ;;  %v1006_v53 = vld [vmem:[#allocation2 + $0x68] sm:$0xff]  ;;  %v1079_v61 = vld [vmem:[#allocation2 + $0x2b0] sm:$0xff] }
 0x360   :  { %v1001_v32 = vld [vmem:[#allocation2 + $0x40] sm:$0xff]  ;;  %1301 = vmatpush.msrb.mxu0 %v1069_v31  ;;  %v2760_v14 = vld.sshfl [vmem:[#allocation1] sm:$0xff pattern:$0x73625140]  ;;  %1360 = vmatpush.msra.mxu1 %v1010_v28  ;;  %v1182_v24 = vld [vmem:[#allocation2 + $0x5e8] sm:$0xff] }
 0x361   :  { %v1065_v10 = vld [vmem:[#allocation2 + $0x240] sm:$0xff]  ;;  %1282 = vmatpush.msrb.mxu3 %v1001_v32  ;;  %v1062_v32 = vld [vmem:[#allocation2 + $0x228] sm:$0xff]  ;;  %1382 = vmatpush.msra.mxu2 %v1066_v30  ;;  %v1019_v28 = vld [vmem:[#allocation2 + $0xd0] sm:$0xff] }
 0x362   :  { %v997_v38 = vld [vmem:[#allocation2 + $0x20] sm:$0xff]  ;;  %1302 = vmatpush.msrb.mxu0 %v1065_v10  ;;  %1361 = vmatpush.msra.mxu1 %v1006_v53  ;;  %v1178_v42 = vld [vmem:[#allocation2 + $0x5c8] sm:$0xff]  ;;  %v1075_v30 = vld [vmem:[#allocation2 + $0x290] sm:$0xff] }
 0x363   :  { %v1061_v39 = vld [vmem:[#allocation2 + $0x220] sm:$0xff]  ;;  %1283 = vmatpush.msrb.mxu3 %v997_v38  ;;  %v1002_v38 = vld [vmem:[#allocation2 + $0x48] sm:$0xff]  ;;  %1383 = vmatpush.msra.mxu2 %v1062_v32  ;;  %v1015_v53 = vld [vmem:[#allocation2 + $0xb0] sm:$0xff] }
 0x364   :  { %v993_v40 = vld [vmem:[#allocation2] sm:$0xff]  ;;  %1303 = vmatpush.msrb.mxu0 %v1061_v39  ;;  %1362 = vmatpush.msra.mxu1 %v1002_v38  ;;  %v998_v7 = vld [vmem:[#allocation2 + $0x28] sm:$0xff]  ;;  %v1071_v32 = vld [vmem:[#allocation2 + $0x270] sm:$0xff] }
 0x365   :  { %v1181_v41 = vld [vmem:[#allocation2 + $0x5e0] sm:$0xff]  ;;  %1284 = vmatpush.msrb.mxu3 %v993_v40  ;;  %v1058_v40 = vld [vmem:[#allocation2 + $0x208] sm:$0xff]  ;;  %v1011_v38 = vld [vmem:[#allocation2 + $0x90] sm:$0xff] }
 0x366   :  { %v1057_v13 = vld [vmem:[#allocation2 + $0x200] sm:$0xff]  ;;  %1285 = vmatmul.f32.vlgmr.msrb.gmra.mxu3 %v2760_v14  ;;  %1384 = vmatpush.msra.mxu2 %v1058_v40  ;;  %v994_v48 = vld [vmem:[#allocation2 + $0x8] sm:$0xff]  ;;  %v1067_v40 = vld [vmem:[#allocation2 + $0x250] sm:$0xff] }
 0x367   :  { %v1245_v16 = vld [vmem:[#allocation2 + $0x7e0] sm:$0xff]  ;;  %1309 = vmatpush.msra.mxu3 %v1181_v41  ;;  %1304 = vmatpush.msrb.mxu0 %v1057_v13  ;;  %v2766_v13 = vld.sshfl [vmem:[#allocation1 + $0x10] sm:$0xff pattern:$0x73625140] }
 0x368   :  { %v1177_v43 = vld [vmem:[#allocation2 + $0x5c0] sm:$0xff]  ;;  %1449 = vmatpush.msrb.mxu2 %v1119_v4  ;;  %1363 = vmatpush.msra.mxu1 %v998_v7  ;;  %v1063_v4 = vld [vmem:[#allocation2 + $0x230] sm:$0xff] }
 0x369   :  { %v2762_v23 = vld.sshfl [vmem:[#allocation1 + $0x8] sm:$0xff pattern:$0x73625140]  ;;  %1329 = vmatpush.msra.mxu0 %v1245_v16  ;;  %1310 = vmatpush.msra.mxu3 %v1177_v43  ;;  %v1246_v16 = vld [vmem:[#allocation2 + $0x7e8] sm:$0xff]  ;;  %v1175_v7 = vld [vmem:[#allocation2 + $0x5b0] sm:$0xff] }
 0x36a   :  { %v1241_v46 = vld [vmem:[#allocation2 + $0x7c0] sm:$0xff]  ;;  %1305 = vmatmul.f32.vlgmr.msrb.gmra.mxu0 %v2762_v23  ;;  %v2768_v43 = vld.sshfl [vmem:[#allocation1 + $0x18] sm:$0xff pattern:$0x73625140]  ;;  %1450 = vmatpush.msrb.mxu2 %v1115_v45 }
 0x36b   :  { %v1173_v25 = vld [vmem:[#allocation2 + $0x5a0] sm:$0xff]  ;;  %1330 = vmatpush.msra.mxu0 %v1241_v46  ;;  %v1242_v46 = vld [vmem:[#allocation2 + $0x7c8] sm:$0xff]  ;;  %1364 = vmatpush.msra.mxu1 %v994_v48  ;;  %v1239_v45 = vld [vmem:[#allocation2 + $0x7b0] sm:$0xff] }
 0x36c   :  { %v1237_v36 = vld [vmem:[#allocation2 + $0x7a0] sm:$0xff]  ;;  %1311 = vmatpush.msra.mxu3 %v1173_v25  ;;  %v1174_v25 = vld [vmem:[#allocation2 + $0x5a8] sm:$0xff]  ;;  %1451 = vmatpush.msrb.mxu2 %v1111_v51  ;;  %v1171_v48 = vld [vmem:[#allocation2 + $0x590] sm:$0xff] }
 0x36d   :  { %v1169_v47 = vld [vmem:[#allocation2 + $0x580] sm:$0xff]  ;;  %1331 = vmatpush.msra.mxu0 %v1237_v36  ;;  %v1238_v36 = vld [vmem:[#allocation2 + $0x7a8] sm:$0xff]  ;;  %1429 = vmatpush.msrb.mxu1 %v1055_v44  ;;  %v1235_v44 = vld [vmem:[#allocation2 + $0x790] sm:$0xff] }
 0x36e   :  { %v1233_v49 = vld [vmem:[#allocation2 + $0x780] sm:$0xff]  ;;  %1312 = vmatpush.msra.mxu3 %v1169_v47  ;;  %v1170_v47 = vld [vmem:[#allocation2 + $0x588] sm:$0xff]  ;;  %1452 = vmatpush.msrb.mxu2 %v1107_v57  ;;  %v999_v51 = vld [vmem:[#allocation2 + $0x30] sm:$0xff] }
 0x36f   :  { %v1165_v50 = vld [vmem:[#allocation2 + $0x560] sm:$0xff]  ;;  %1332 = vmatpush.msra.mxu0 %v1233_v49  ;;  %v1234_v49 = vld [vmem:[#allocation2 + $0x788] sm:$0xff]  ;;  %1430 = vmatpush.msrb.mxu1 %v1051_v56  ;;  %v1163_v56 = vld [vmem:[#allocation2 + $0x550] sm:$0xff] }
 0x370   :  { %v1229_v52 = vld [vmem:[#allocation2 + $0x760] sm:$0xff]  ;;  %1313 = vmatpush.msra.mxu3 %v1165_v50  ;;  %v1166_v50 = vld [vmem:[#allocation2 + $0x568] sm:$0xff]  ;;  %1453 = vmatpush.msrb.mxu2 %v1103_v54  ;;  %v1227_v57 = vld [vmem:[#allocation2 + $0x750] sm:$0xff] }
 0x371   :  { %v1161_v58 = vld [vmem:[#allocation2 + $0x540] sm:$0xff]  ;;  %1333 = vmatpush.msra.mxu0 %v1229_v52  ;;  %v1230_v52 = vld [vmem:[#allocation2 + $0x768] sm:$0xff]  ;;  %1431 = vmatpush.msrb.mxu1 %v1047_v55  ;;  %v1159_v55 = vld [vmem:[#allocation2 + $0x530] sm:$0xff] }
 0x372   :  { %v1225_v59 = vld [vmem:[#allocation2 + $0x740] sm:$0xff]  ;;  %1314 = vmatpush.msra.mxu3 %v1161_v58  ;;  %v1162_v58 = vld [vmem:[#allocation2 + $0x548] sm:$0xff]  ;;  %1454 = vmatpush.msrb.mxu2 %v1099_v0  ;;  %v1223_v54 = vld [vmem:[#allocation2 + $0x730] sm:$0xff] }
 0x373   :  { %v1157_v60 = vld [vmem:[#allocation2 + $0x520] sm:$0xff]  ;;  %1334 = vmatpush.msra.mxu0 %v1225_v59  ;;  %v1226_v59 = vld [vmem:[#allocation2 + $0x748] sm:$0xff]  ;;  %1432 = vmatpush.msrb.mxu1 %v1043_v62  ;;  %v1155_v62 = vld [vmem:[#allocation2 + $0x510] sm:$0xff] }
 0x374   :  { %v1221_v17 = vld [vmem:[#allocation2 + $0x720] sm:$0xff]  ;;  %1315 = vmatpush.msra.mxu3 %v1157_v60  ;;  %v1158_v60 = vld [vmem:[#allocation2 + $0x528] sm:$0xff]  ;;  %1455 = vmatpush.msrb.mxu2 %v1095_v2  ;;  %v1219_v0 = vld [vmem:[#allocation2 + $0x710] sm:$0xff] }
 0x375   :  { %v1153_v63 = vld [vmem:[#allocation2 + $0x500] sm:$0xff]  ;;  %1335 = vmatpush.msra.mxu0 %v1221_v17  ;;  %v1222_v17 = vld [vmem:[#allocation2 + $0x728] sm:$0xff]  ;;  %1433 = vmatpush.msrb.mxu1 %v1039_v26  ;;  %v1151_v26 = vld [vmem:[#allocation2 + $0x4f0] sm:$0xff] }
 0x376   :  { %v1217_v37 = vld [vmem:[#allocation2 + $0x700] sm:$0xff]  ;;  %1316 = vmatpush.msra.mxu3 %v1153_v63  ;;  %v1154_v63 = vld [vmem:[#allocation2 + $0x508] sm:$0xff]  ;;  %1456 = vmatpush.msrb.mxu2 %v1091_v8  ;;  %v1048_v2 = vld [vmem:[#allocation2 + $0x1b8] sm:$0xff] }
 0x377   :  { %v1149_v1 = vld [vmem:[#allocation2 + $0x4e0] sm:$0xff]  ;;  %1336 = vmatpush.msra.mxu0 %v1217_v37  ;;  %v1218_v37 = vld [vmem:[#allocation2 + $0x708] sm:$0xff]  ;;  %1434 = vmatpush.msrb.mxu1 %v1035_v6  ;;  %v1104_v6 = vld [vmem:[#allocation2 + $0x378] sm:$0xff] }
 0x378   :  { %v1213_v3 = vld [vmem:[#allocation2 + $0x6e0] sm:$0xff]  ;;  %1317 = vmatpush.msra.mxu3 %v1149_v1  ;;  %v1150_v1 = vld [vmem:[#allocation2 + $0x4e8] sm:$0xff]  ;;  %1457 = vmatpush.msrb.mxu2 %v1087_v12  ;;  %v1044_v8 = vld [vmem:[#allocation2 + $0x198] sm:$0xff] }
 0x379   :  { %v1145_v33 = vld [vmem:[#allocation2 + $0x4c0] sm:$0xff]  ;;  %1337 = vmatpush.msra.mxu0 %v1213_v3  ;;  %v1214_v3 = vld [vmem:[#allocation2 + $0x6e8] sm:$0xff]  ;;  %1435 = vmatpush.msrb.mxu1 %v1031_v11  ;;  %v1100_v11 = vld [vmem:[#allocation2 + $0x358] sm:$0xff] }
 0x37a   :  { %v1209_v9 = vld [vmem:[#allocation2 + $0x6c0] sm:$0xff]  ;;  %1318 = vmatpush.msra.mxu3 %v1145_v33  ;;  %v1146_v33 = vld [vmem:[#allocation2 + $0x4c8] sm:$0xff]  ;;  %1458 = vmatpush.msrb.mxu2 %v1083_v19  ;;  %v1040_v12 = vld [vmem:[#allocation2 + $0x178] sm:$0xff] }
 0x37b   :  { %v1141_v34 = vld [vmem:[#allocation2 + $0x4a0] sm:$0xff]  ;;  %1338 = vmatpush.msra.mxu0 %v1209_v9  ;;  %v1210_v9 = vld [vmem:[#allocation2 + $0x6c8] sm:$0xff]  ;;  %1436 = vmatpush.msrb.mxu1 %v1027_v5  ;;  %v1096_v5 = vld [vmem:[#allocation2 + $0x338] sm:$0xff] }
 0x37c   :  { %v1205_v15 = vld [vmem:[#allocation2 + $0x6a0] sm:$0xff]  ;;  %1319 = vmatpush.msra.mxu3 %v1141_v34  ;;  %v1142_v34 = vld [vmem:[#allocation2 + $0x4a8] sm:$0xff]  ;;  %1459 = vmatpush.msrb.mxu2 %v1079_v61  ;;  %v1036_v19 = vld [vmem:[#allocation2 + $0x158] sm:$0xff] }
 0x37d   :  { %v1137_v18 = vld [vmem:[#allocation2 + $0x480] sm:$0xff]  ;;  %1339 = vmatpush.msra.mxu0 %v1205_v15  ;;  %v1206_v15 = vld [vmem:[#allocation2 + $0x6a8] sm:$0xff]  ;;  %1437 = vmatpush.msrb.mxu1 %v1023_v21  ;;  %v1092_v21 = vld [vmem:[#allocation2 + $0x318] sm:$0xff] }
 0x37e   :  { %v1201_v20 = vld [vmem:[#allocation2 + $0x680] sm:$0xff]  ;;  %1320 = vmatpush.msra.mxu3 %v1137_v18  ;;  %v1138_v18 = vld [vmem:[#allocation2 + $0x488] sm:$0xff]  ;;  %1460 = vmatpush.msrb.mxu2 %v1075_v30  ;;  %v1032_v61 = vld [vmem:[#allocation2 + $0x138] sm:$0xff] }
 0x37f   :  { %v1133_v22 = vld [vmem:[#allocation2 + $0x460] sm:$0xff]  ;;  %1340 = vmatpush.msra.mxu0 %v1201_v20  ;;  %v1202_v20 = vld [vmem:[#allocation2 + $0x688] sm:$0xff]  ;;  %1438 = vmatpush.msrb.mxu1 %v1019_v28  ;;  %v1088_v28 = vld [vmem:[#allocation2 + $0x2f8] sm:$0xff] }
 0x380   :  { %v1197_v27 = vld [vmem:[#allocation2 + $0x660] sm:$0xff]  ;;  %1321 = vmatpush.msra.mxu3 %v1133_v22  ;;  %v1134_v22 = vld [vmem:[#allocation2 + $0x468] sm:$0xff]  ;;  %1461 = vmatpush.msrb.mxu2 %v1071_v32  ;;  %v1028_v30 = vld [vmem:[#allocation2 + $0x118] sm:$0xff] }
 0x381   :  { %v1129_v29 = vld [vmem:[#allocation2 + $0x440] sm:$0xff]  ;;  %1341 = vmatpush.msra.mxu0 %v1197_v27  ;;  %v1198_v27 = vld [vmem:[#allocation2 + $0x668] sm:$0xff]  ;;  %1439 = vmatpush.msrb.mxu1 %v1015_v53  ;;  %v1084_v53 = vld [vmem:[#allocation2 + $0x2d8] sm:$0xff] }
 0x382   :  { %v1193_v35 = vld [vmem:[#allocation2 + $0x640] sm:$0xff]  ;;  %1322 = vmatpush.msra.mxu3 %v1129_v29  ;;  %v1130_v29 = vld [vmem:[#allocation2 + $0x448] sm:$0xff]  ;;  %1462 = vmatpush.msrb.mxu2 %v1067_v40  ;;  %v1024_v32 = vld [vmem:[#allocation2 + $0xf8] sm:$0xff] }
 0x383   :  { %v1125_v31 = vld [vmem:[#allocation2 + $0x420] sm:$0xff]  ;;  %1342 = vmatpush.msra.mxu0 %v1193_v35  ;;  %v1194_v35 = vld [vmem:[#allocation2 + $0x648] sm:$0xff]  ;;  %1440 = vmatpush.msrb.mxu1 %v1011_v38  ;;  %v1080_v38 = vld [vmem:[#allocation2 + $0x2b8] sm:$0xff] }
 0x384   :  { %v1189_v10 = vld [vmem:[#allocation2 + $0x620] sm:$0xff]  ;;  %1323 = vmatpush.msra.mxu3 %v1125_v31  ;;  %v1126_v31 = vld [vmem:[#allocation2 + $0x428] sm:$0xff]  ;;  %1463 = vmatpush.msrb.mxu2 %v1063_v4  ;;  %v1187_v40 = vld [vmem:[#allocation2 + $0x610] sm:$0xff] }
 0x385   :  { %v1121_v39 = vld [vmem:[#allocation2 + $0x400] sm:$0xff]  ;;  %1343 = vmatpush.msra.mxu0 %v1189_v10  ;;  %v1190_v10 = vld [vmem:[#allocation2 + $0x628] sm:$0xff]  ;;  %1385 = vmatmul.f32.vlgmr.msra.gmra.mxu2 %v2762_v23  ;;  %v1176_v4 = vld [vmem:[#allocation2 + $0x5b8] sm:$0xff] }
 0x386   :  { %v1185_v41 = vld [vmem:[#allocation2 + $0x600] sm:$0xff]  ;;  %1324 = vmatpush.msra.mxu3 %v1121_v39  ;;  %v1122_v39 = vld [vmem:[#allocation2 + $0x408] sm:$0xff]  ;;  %1365 = vmatmul.f32.vlgmr.msra.gmra.mxu1 %v2760_v14 }
 0x387   :  { %1344 = vmatpush.msra.mxu0 %v1185_v41  ;;  %1325 = vmatmul.f32.vlgmr.msra.gmra.mxu3 %v2766_v13  ;;  %v1186_v41 = vld [vmem:[#allocation2 + $0x608] sm:$0xff] }
 0x388   :  { %1389 = vmatpush.msrb.mxu3 %v1182_v24  ;;  %1345 = vmatmul.f32.vlgmr.msra.gmra.mxu0 %v2768_v43  ;;  %v1183_v24 = vld [vmem:[#allocation2 + $0x5f0] sm:$0xff] }
 0x389   :  { %1409 = vmatpush.msrb.mxu0 %v1246_v16  ;;  %v1247_v16 = vld [vmem:[#allocation2 + $0x7f0] sm:$0xff] }
 0x38a   :  { %1390 = vmatpush.msrb.mxu3 %v1178_v42  ;;  %v1007_v42 = vld [vmem:[#allocation2 + $0x70] sm:$0xff] }
 0x38b   :  { %1410 = vmatpush.msrb.mxu0 %v1242_v46  ;;  %v1179_v46 = vld [vmem:[#allocation2 + $0x5d0] sm:$0xff]  ;;  %1441 = vmatpush.msrb.mxu1 %v1007_v42  ;;  %v1244_v42 = vld [vmem:[#allocation2 + $0x7d8] sm:$0xff] }
 0x38c   :  { %1391 = vmatpush.msrb.mxu3 %v1174_v25  ;;  %v1243_v25 = vld [vmem:[#allocation2 + $0x7d0] sm:$0xff] }
 0x38d   :  { %1411 = vmatpush.msrb.mxu0 %v1238_v36  ;;  %v1003_v36 = vld [vmem:[#allocation2 + $0x50] sm:$0xff] }
 0x38e   :  { %1392 = vmatpush.msrb.mxu3 %v1170_v47  ;;  %v1059_v47 = vld [vmem:[#allocation2 + $0x210] sm:$0xff]  ;;  %1442 = vmatpush.msrb.mxu1 %v1003_v36  ;;  %v1172_v36 = vld [vmem:[#allocation2 + $0x598] sm:$0xff] }
 0x38f   :  { %1412 = vmatpush.msrb.mxu0 %v1234_v49  ;;  %v1120_v49 = vld [vmem:[#allocation2 + $0x3f8] sm:$0xff]  ;;  %1464 = vmatpush.msrb.mxu2 %v1059_v47 }
 0x390   :  { %1393 = vmatpush.msrb.mxu3 %v1166_v50  ;;  %v1167_v50 = vld [vmem:[#allocation2 + $0x570] sm:$0xff]  ;;  %1443 = vmatpush.msrb.mxu1 %v999_v51  ;;  %v1236_v47 = vld [vmem:[#allocation2 + $0x798] sm:$0xff] }
 0x391   :  { %1413 = vmatpush.msrb.mxu0 %v1230_v52  ;;  %v1231_v52 = vld [vmem:[#allocation2 + $0x770] sm:$0xff]  ;;  %1529 = vmatpush.msra.mxu2 %v1120_v49  ;;  %v1012_v49 = vld [vmem:[#allocation2 + $0x98] sm:$0xff] }
 0x392   :  { %1394 = vmatpush.msrb.mxu3 %v1162_v58  ;;  %v1116_v58 = vld [vmem:[#allocation2 + $0x3d8] sm:$0xff]  ;;  %1465 = vmatmul.f32.vlgmr.msrb.gmra.mxu2 %v2762_v23 }
 0x393   :  { %1414 = vmatpush.msrb.mxu0 %v1226_v59  ;;  %v995_v59 = vld [vmem:[#allocation2 + $0x10] sm:$0xff]  ;;  %1530 = vmatpush.msra.mxu2 %v1116_v58  ;;  %v1164_v51 = vld [vmem:[#allocation2 + $0x558] sm:$0xff] }
 0x394   :  { %1395 = vmatpush.msrb.mxu3 %v1158_v60  ;;  %v1056_v60 = vld [vmem:[#allocation2 + $0x1f8] sm:$0xff]  ;;  %1444 = vmatpush.msrb.mxu1 %v995_v59 }
 0x395   :  { %1415 = vmatpush.msrb.mxu0 %v1222_v17  ;;  %v1112_v17 = vld [vmem:[#allocation2 + $0x3b8] sm:$0xff]  ;;  %1445 = vmatmul.f32.vlgmr.msrb.gmra.mxu1 %v2760_v14 }
 0x396   :  { %1396 = vmatpush.msrb.mxu3 %v1154_v63  ;;  %v1052_v63 = vld [vmem:[#allocation2 + $0x1d8] sm:$0xff]  ;;  %1509 = vmatpush.msra.mxu1 %v1056_v60 }
 0x397   :  { %1416 = vmatpush.msrb.mxu0 %v1218_v37  ;;  %v1108_v37 = vld [vmem:[#allocation2 + $0x398] sm:$0xff]  ;;  %1531 = vmatpush.msra.mxu2 %v1112_v17 }
 0x398   :  { %1397 = vmatpush.msrb.mxu3 %v1150_v1  ;;  %v1215_v1 = vld [vmem:[#allocation2 + $0x6f0] sm:$0xff]  ;;  %1510 = vmatpush.msra.mxu1 %v1052_v63  ;;  %v1064_v58 = vld [vmem:[#allocation2 + $0x238] sm:$0xff] }
 0x399   :  { %1417 = vmatpush.msrb.mxu0 %v1214_v3  ;;  %v1147_v3 = vld [vmem:[#allocation2 + $0x4d0] sm:$0xff]  ;;  %1532 = vmatpush.msra.mxu2 %v1108_v37  ;;  %v1004_v59 = vld [vmem:[#allocation2 + $0x58] sm:$0xff] }
 0x39a   :  { %1398 = vmatpush.msrb.mxu3 %v1146_v33  ;;  %v1211_v33 = vld [vmem:[#allocation2 + $0x6d0] sm:$0xff]  ;;  %1511 = vmatpush.msra.mxu1 %v1048_v2  ;;  %v1060_v60 = vld [vmem:[#allocation2 + $0x218] sm:$0xff] }
 0x39b   :  { %1418 = vmatpush.msrb.mxu0 %v1210_v9  ;;  %v1143_v9 = vld [vmem:[#allocation2 + $0x4b0] sm:$0xff]  ;;  %1533 = vmatpush.msra.mxu2 %v1104_v6  ;;  %v1220_v17 = vld [vmem:[#allocation2 + $0x718] sm:$0xff] }
 0x39c   :  { %1399 = vmatpush.msrb.mxu3 %v1142_v34  ;;  %v1207_v34 = vld [vmem:[#allocation2 + $0x6b0] sm:$0xff]  ;;  %1512 = vmatpush.msra.mxu1 %v1044_v8  ;;  %v1000_v63 = vld [vmem:[#allocation2 + $0x38] sm:$0xff] }
 0x39d   :  { %1419 = vmatpush.msrb.mxu0 %v1206_v15  ;;  %v1139_v15 = vld [vmem:[#allocation2 + $0x490] sm:$0xff]  ;;  %1534 = vmatpush.msra.mxu2 %v1100_v11  ;;  %v1148_v37 = vld [vmem:[#allocation2 + $0x4d8] sm:$0xff] }
 0x39e   :  { %1400 = vmatpush.msrb.mxu3 %v1138_v18  ;;  %v1203_v18 = vld [vmem:[#allocation2 + $0x690] sm:$0xff]  ;;  %1513 = vmatpush.msra.mxu1 %v1040_v12  ;;  %v1144_v2 = vld [vmem:[#allocation2 + $0x4b8] sm:$0xff] }
 0x39f   :  { %1420 = vmatpush.msrb.mxu0 %v1202_v20  ;;  %v1135_v20 = vld [vmem:[#allocation2 + $0x470] sm:$0xff]  ;;  %1535 = vmatpush.msra.mxu2 %v1096_v5  ;;  %v1140_v6 = vld [vmem:[#allocation2 + $0x498] sm:$0xff] }
 0x3a0   :  { %1401 = vmatpush.msrb.mxu3 %v1134_v22  ;;  %v1199_v22 = vld [vmem:[#allocation2 + $0x670] sm:$0xff]  ;;  %1514 = vmatpush.msra.mxu1 %v1036_v19  ;;  %v1136_v8 = vld [vmem:[#allocation2 + $0x478] sm:$0xff] }
 0x3a1   :  { %1421 = vmatpush.msrb.mxu0 %v1198_v27  ;;  %v1131_v27 = vld [vmem:[#allocation2 + $0x450] sm:$0xff]  ;;  %1536 = vmatpush.msra.mxu2 %v1092_v21  ;;  %v1196_v11 = vld [vmem:[#allocation2 + $0x658] sm:$0xff] }
 0x3a2   :  { %1402 = vmatpush.msrb.mxu3 %v1130_v29  ;;  %v1195_v29 = vld [vmem:[#allocation2 + $0x650] sm:$0xff]  ;;  %1515 = vmatpush.msra.mxu1 %v1032_v61  ;;  %v1192_v12 = vld [vmem:[#allocation2 + $0x638] sm:$0xff] }
 0x3a3   :  { %1422 = vmatpush.msrb.mxu0 %v1194_v35  ;;  %v1127_v35 = vld [vmem:[#allocation2 + $0x430] sm:$0xff]  ;;  %1537 = vmatpush.msra.mxu2 %v1088_v28  ;;  %v1188_v5 = vld [vmem:[#allocation2 + $0x618] sm:$0xff] }
 0x3a4   :  { %1403 = vmatpush.msrb.mxu3 %v1126_v31  ;;  %v1191_v31 = vld [vmem:[#allocation2 + $0x630] sm:$0xff]  ;;  %1516 = vmatpush.msra.mxu1 %v1028_v30 }
 0x3a5   :  { %1423 = vmatpush.msrb.mxu0 %v1190_v10  ;;  %v1123_v10 = vld [vmem:[#allocation2 + $0x410] sm:$0xff]  ;;  %1538 = vmatpush.msra.mxu2 %v1084_v53 }
 0x3a6   :  { %1404 = vmatpush.msrb.mxu3 %v1122_v39  ;;  %v1184_v39 = vld [vmem:[#allocation2 + $0x5f8] sm:$0xff]  ;;  %1517 = vmatpush.msra.mxu1 %v1024_v32 }
 0x3a7   :  { %1424 = vmatpush.msrb.mxu0 %v1186_v41  ;;  %1405 = vmatmul.f32.vlgmr.msrb.gmra.mxu3 %v2766_v13  ;;  %v1180_v41 = vld [vmem:[#allocation2 + $0x5d8] sm:$0xff] }
 0x3a8   :  { %1469 = vmatpush.msra.mxu3 %v1183_v24  ;;  %1425 = vmatmul.f32.vlgmr.msrb.gmra.mxu0 %v2768_v43  ;;  %v1248_v24 = vld [vmem:[#allocation2 + $0x7f8] sm:$0xff] }
 0x3a9   :  { %1489 = vmatpush.msra.mxu0 %v1247_v16  ;;  %1539 = vmatpush.msra.mxu2 %v1080_v38  ;;  %v1020_v16 = vld [vmem:[#allocation2 + $0xd8] sm:$0xff] }
 0x3aa   :  { %1470 = vmatpush.msra.mxu3 %v1179_v46  ;;  %v1076_v46 = vld [vmem:[#allocation2 + $0x298] sm:$0xff]  ;;  %1518 = vmatpush.msra.mxu1 %v1020_v16 }
 0x3ab   :  { %1490 = vmatpush.msra.mxu0 %v1243_v25  ;;  %v1016_v25 = vld [vmem:[#allocation2 + $0xb8] sm:$0xff]  ;;  %1540 = vmatpush.msra.mxu2 %v1076_v46 }
 0x3ac   :  { %1471 = vmatpush.msra.mxu3 %v1175_v7  ;;  %v1240_v7 = vld [vmem:[#allocation2 + $0x7b8] sm:$0xff]  ;;  %1519 = vmatpush.msra.mxu1 %v1016_v25 }
 0x3ad   :  { %1491 = vmatpush.msra.mxu0 %v1239_v45  ;;  %v1072_v45 = vld [vmem:[#allocation2 + $0x278] sm:$0xff] }
 0x3ae   :  { %1472 = vmatpush.msra.mxu3 %v1171_v48  ;;  %v1168_v48 = vld [vmem:[#allocation2 + $0x578] sm:$0xff]  ;;  %1541 = vmatpush.msra.mxu2 %v1072_v45 }
 0x3af   :  { %1492 = vmatpush.msra.mxu0 %v1235_v44  ;;  %v1232_v44 = vld [vmem:[#allocation2 + $0x778] sm:$0xff]  ;;  %1520 = vmatpush.msra.mxu1 %v1012_v49 }
 0x3b0   :  { %1473 = vmatpush.msra.mxu3 %v1167_v50  ;;  %v1068_v50 = vld [vmem:[#allocation2 + $0x258] sm:$0xff] }
 0x3b1   :  { %1493 = vmatpush.msra.mxu0 %v1231_v52  ;;  %v1008_v52 = vld [vmem:[#allocation2 + $0x78] sm:$0xff]  ;;  %1542 = vmatpush.msra.mxu2 %v1068_v50 }
 0x3b2   :  { %1474 = vmatpush.msra.mxu3 %v1163_v56  ;;  %v1228_v56 = vld [vmem:[#allocation2 + $0x758] sm:$0xff]  ;;  %1521 = vmatpush.msra.mxu1 %v1008_v52 }
 0x3b3   :  { %1494 = vmatpush.msra.mxu0 %v1227_v57  ;;  %v1160_v57 = vld [vmem:[#allocation2 + $0x538] sm:$0xff]  ;;  %1543 = vmatpush.msra.mxu2 %v1064_v58 }
 0x3b4   :  { %1475 = vmatpush.msra.mxu3 %v1159_v55  ;;  %v1224_v55 = vld [vmem:[#allocation2 + $0x738] sm:$0xff]  ;;  %1522 = vmatpush.msra.mxu1 %v1004_v59 }
 0x3b5   :  { %1495 = vmatpush.msra.mxu0 %v1223_v54  ;;  %v1156_v54 = vld [vmem:[#allocation2 + $0x518] sm:$0xff]  ;;  %1544 = vmatpush.msra.mxu2 %v1060_v60 }
 0x3b6   :  { %1476 = vmatpush.msra.mxu3 %v1155_v62  ;;  %v1152_v62 = vld [vmem:[#allocation2 + $0x4f8] sm:$0xff]  ;;  %1545 = vmatmul.f32.vlgmr.msra.gmra.mxu2 %v2762_v23 }
 0x3b7   :  { %1496 = vmatpush.msra.mxu0 %v1219_v0  ;;  %v1216_v0 = vld [vmem:[#allocation2 + $0x6f8] sm:$0xff]  ;;  %1523 = vmatpush.msra.mxu1 %v1000_v63 }
 0x3b8   :  { %1477 = vmatpush.msra.mxu3 %v1151_v26  ;;  %v996_v26 = vld [vmem:[#allocation2 + $0x18] sm:$0xff] }
 0x3b9   :  { %1497 = vmatpush.msra.mxu0 %v1215_v1  ;;  %v1212_v1 = vld [vmem:[#allocation2 + $0x6d8] sm:$0xff]  ;;  %1524 = vmatpush.msra.mxu1 %v996_v26 }
 0x3ba   :  { %1478 = vmatpush.msra.mxu3 %v1147_v3  ;;  %v1208_v3 = vld [vmem:[#allocation2 + $0x6b8] sm:$0xff]  ;;  %1525 = vmatmul.f32.vlgmr.msra.gmra.mxu1 %v2760_v14 }
 0x3bb   :  { %1498 = vmatpush.msra.mxu0 %v1211_v33  ;;  %v1204_v33 = vld [vmem:[#allocation2 + $0x698] sm:$0xff] }
 0x3bc   :  { %1479 = vmatpush.msra.mxu3 %v1143_v9  ;;  %v1200_v9 = vld [vmem:[#allocation2 + $0x678] sm:$0xff] }
 0x3bd   :  { %1499 = vmatpush.msra.mxu0 %v1207_v34  ;;  %v1132_v23 = vld [vmem:[#allocation2 + $0x458] sm:$0xff] }
 0x3be   :  { %1480 = vmatpush.msra.mxu3 %v1139_v15  ;;  %v1128_v34 = vld [vmem:[#allocation2 + $0x438] sm:$0xff] }
 0x3bf   :  { %1500 = vmatpush.msra.mxu0 %v1203_v18  ;;  %v1124_v15 = vld [vmem:[#allocation2 + $0x418] sm:$0xff] }
 0x3c0   :  { %1481 = vmatpush.msra.mxu3 %v1135_v20  ;;  %v1249_v14 = vld [vmem:[%s2969_s7] sm:$0xf] }
 0x3c1   :  { %1501 = vmatpush.msra.mxu0 %v1199_v22  ;;  %v1251_v18 = vperm.slane %v1249_v14, 0  ;;  %v1252_v53 = vperm.slane %v1249_v14, 1  ;;  %v1254_v50 = vperm.slane %v1249_v14, 3 }
 0x3c2   :  { %1482 = vmatpush.msra.mxu3 %v1131_v27 }
 0x3c3   :  { %1502 = vmatpush.msra.mxu0 %v1195_v29  ;;  %v1593_v29 = vstv %s2316_s17 }
 0x3c4   :  { %1483 = vmatpush.msra.mxu3 %v1127_v35 }
 0x3c5   :  { %1503 = vmatpush.msra.mxu0 %v1191_v31 }
 0x3c6   :  { %1484 = vmatpush.msra.mxu3 %v1123_v10 }
 0x3c7   :  { %1504 = vmatpush.msra.mxu0 %v1187_v40  ;;  %1485 = vmatmul.f32.vlgmr.msra.gmra.mxu3 %v2766_v13 }
 0x3c8   :  { %1549 = vmatpush.msrb.mxu3 %v1184_v39  ;;  %1505 = vmatmul.f32.vlgmr.msra.gmra.mxu0 %v2768_v43 }
 0x3c9   :  { %1569 = vmatpush.msrb.mxu0 %v1248_v24 }
 0x3ca   :  { %1550 = vmatpush.msrb.mxu3 %v1180_v41 }
 0x3cb   :  { %1570 = vmatpush.msrb.mxu0 %v1244_v42  ;;  %v1253_v42 = vperm.slane %v1249_v14, 2 }
 0x3cc   :  { %1551 = vmatpush.msrb.mxu3 %v1176_v4 }
 0x3cd   :  { %1571 = vmatpush.msrb.mxu0 %v1240_v7 }
 0x3ce   :  { %1552 = vmatpush.msrb.mxu3 %v1172_v36 }
 0x3cf   :  { %1572 = vmatpush.msrb.mxu0 %v1236_v47 }
 0x3d0   :  { %1553 = vmatpush.msrb.mxu3 %v1168_v48 }
 0x3d1   :  { %1573 = vmatpush.msrb.mxu0 %v1232_v44 }
 0x3d2   :  { %1554 = vmatpush.msrb.mxu3 %v1164_v51 }
 0x3d3   :  { %1574 = vmatpush.msrb.mxu0 %v1228_v56 }
 0x3d4   :  { %1555 = vmatpush.msrb.mxu3 %v1160_v57 }
 0x3d5   :  { %1575 = vmatpush.msrb.mxu0 %v1224_v55 }
 0x3d6   :  { %1556 = vmatpush.msrb.mxu3 %v1156_v54 }
 0x3d7   :  { %1576 = vmatpush.msrb.mxu0 %v1220_v17 }
 0x3d8   :  { %1557 = vmatpush.msrb.mxu3 %v1152_v62 }
 0x3d9   :  { %1577 = vmatpush.msrb.mxu0 %v1216_v0 }
 0x3da   :  { %1558 = vmatpush.msrb.mxu3 %v1148_v37 }
 0x3db   :  { %1578 = vmatpush.msrb.mxu0 %v1212_v1 }
 0x3dc   :  { %1559 = vmatpush.msrb.mxu3 %v1144_v2 }
 0x3dd   :  { %1579 = vmatpush.msrb.mxu0 %v1208_v3 }
 0x3de   :  { %1560 = vmatpush.msrb.mxu3 %v1140_v6 }
 0x3df   :  { %1580 = vmatpush.msrb.mxu0 %v1204_v33 }
 0x3e0   :  { %1561 = vmatpush.msrb.mxu3 %v1136_v8 }
 0x3e1   :  { %1581 = vmatpush.msrb.mxu0 %v1200_v9 }
 0x3e2   :  { %1562 = vmatpush.msrb.mxu3 %v1132_v23 }
 0x3e3   :  { %1582 = vmatpush.msrb.mxu0 %v1196_v11 }
 0x3e4   :  { %1563 = vmatpush.msrb.mxu3 %v1128_v34 }
 0x3e5   :  { %1583 = vmatpush.msrb.mxu0 %v1192_v12 }
 0x3e6   :  { %1564 = vmatpush.msrb.mxu3 %v1124_v15 }
 0x3e7   :  { %1565 = vmatmul.f32.vlgmr.msrb.gmra.mxu3 %v2766_v13  ;;  %1584 = vmatpush.msrb.mxu0 %v1188_v5  ;;  %v1306_v20 = vpop.f32.mrf.mxu0 }
 0x3e8   :  { %1585 = vmatmul.f32.vlgmr.msrb.gmra.mxu0 %v2768_v43 }
 0x3e9   :  { %v1286_v19 = vpop.f32.mrf.mxu3 }
 0x3ea   :  { %v1287_v21 = vadd.f32 %v1286_v19, %v1251_v18 }
 0x3ec   :  { %v1307_v22 = vadd.f32 %v1306_v20, %v1287_v21 }
 0x403   :  { %v1366_v43 = vpop.f32.mrf.mxu1 }
 0x404   :  { %v1367_v32 = vadd.f32 %v1366_v43, %v1252_v53 }
 0x405   :  { %v1346_v27 = vpop.f32.mrf.mxu0 }
 0x408   :  { %v1386_v31 = vpop.f32.mrf.mxu2 }
 0x409   :  { %v1387_v10 = vadd.f32 %v1386_v31, %v1367_v32 }
 0x40a   :  { %v1326_v61 = vpop.f32.mrf.mxu3 }
 0x40b   :  { %v1327_v28 = vadd.f32 %v1326_v61, %v1307_v22 }
 0x40d   :  { %v1347_v30 = vadd.f32 %v1346_v27, %v1327_v28 }
 0x40f   :  { %vm1589_vm0 = vcmp.ge.f32.partialorder %v1347_v30, 0.0  ;;  %v1594_v35 = vmul.f32 %v1593_v29, %v1347_v30 }
 0x411   :  { %v2788_v13 = vsel %vm1589_vm0, %v1347_v30, %v1594_v35 }
 0x412   :  { %v1446_v46 = vpop.f32.mrf.mxu1 }
 0x413   :  { %v1447_v25 = vadd.f32 %v1446_v46, %v1253_v42 }
 0x415   :  { %v1466_v4 = vpop.f32.mrf.mxu2 }
 0x416   :  { %v1467_v7 = vadd.f32 %v1466_v4, %v1447_v25 }
 0x425   :  { %v1426_v40 = vpop.f32.mrf.mxu0 }
 0x42a   :  { %v1406_v38 = vpop.f32.mrf.mxu3 }
 0x42b   :  { %v1407_v39 = vadd.f32 %v1406_v38, %v1387_v10 }
 0x42d   :  { %v1427_v24 = vadd.f32 %v1426_v40, %v1407_v39 }
 0x42f   :  { %vm1590_vm1 = vcmp.ge.f32.partialorder %v1427_v24, 0.0  ;;  %v1595_v41 = vmul.f32 %v1593_v29, %v1427_v24 }
 0x431   :  { %v2790_v16 = vsel %vm1590_vm1, %v1427_v24, %v1595_v41 }
 0x437   :  { %v1526_v51 = vpop.f32.mrf.mxu1 }
 0x438   :  { %v1527_v52 = vadd.f32 %v1526_v51, %v1254_v50 }
 0x439   :  { %v1546_v56 = vpop.f32.mrf.mxu2 }
 0x43a   :  { %v1547_v58 = vadd.f32 %v1546_v56, %v1527_v52 }
 0x445   :  { %v1506_v47 = vpop.f32.mrf.mxu0 }
 0x44a   :  { %v1486_v36 = vpop.f32.mrf.mxu3 }
 0x44b   :  { %v1487_v45 = vadd.f32 %v1486_v36, %v1467_v7 }
 0x44d   :  { %v1507_v48 = vadd.f32 %v1506_v47, %v1487_v45 }
 0x44f   :  { %vm1591_vm2 = vcmp.ge.f32.partialorder %v1507_v48, 0.0  ;;  %v1596_v49 = vmul.f32 %v1593_v29, %v1507_v48 }
 0x451   :  { %v2792_v44 = vsel %vm1591_vm2, %v1507_v48, %v1596_v49 }
 0x465   :  { %v1586_v59 = vpop.f32.mrf.mxu0 }
 0x46a   :  { %v1566_v57 = vpop.f32.mrf.mxu3 }
 0x46b   :  { %v1567_v55 = vadd.f32 %v1566_v57, %v1547_v58 }
 0x46d   :  { %v1587_v60 = vadd.f32 %v1586_v59, %v1567_v55 }
 0x46f   :  { %vm1592_vm3 = vcmp.ge.f32.partialorder %v1587_v60, 0.0  ;;  %v1597_v54 = vmul.f32 %v1593_v29, %v1587_v60 }
 0x471   :  { %v2794_v17 = vsel %vm1592_vm3, %v1587_v60, %v1597_v54 }
 0x472   :  { %2228 = dma.done.wait [#allocation4 + $0x1], 16384 }
 0x473   :  { %2229 = vsyncadd [#allocation4 + $0x1], 4294950912  ;;  %v1667_v62 = vld [vmem:[#allocation3 + $0x1f0] sm:$0xff]  ;;  %v1665_v63 = vld [vmem:[#allocation3 + $0x1e0] sm:$0xff]  ;;  %s2035_s20 = sshll.u32 %s2976_s14, 4  ;;  %vm2026_vm7 = vcmask 74752   ;;  %s2036_s20 = int_to_ptr.hbm [resolvable:$true] %s2035_s20 }
 0x474   :  { %v1699_v0 = vld [vmem:[#allocation3 + $0x2f0] sm:$0xff]  ;;  %1759 = vmatpush.msrb.mxu2 %v1667_v62  ;;  %v1697_v26 = vld [vmem:[#allocation3 + $0x2e0] sm:$0xff]  ;;  %v1668_v62 = vld [vmem:[#allocation3 + $0x1f8] sm:$0xff] }
 0x475   :  { %1779 = vmatpush.msra.mxu3 %v1699_v0  ;;  %v1635_v37 = vld [vmem:[#allocation3 + $0xf0] sm:$0xff]  ;;  %v1633_v2 = vld [vmem:[#allocation3 + $0xe0] sm:$0xff] }
 0x476   :  { %1739 = vmatpush.msrb.mxu1 %v1635_v37  ;;  %v1663_v1 = vld [vmem:[#allocation3 + $0x1d0] sm:$0xff]  ;;  %1760 = vmatpush.msrb.mxu2 %v1665_v63  ;;  %v1661_v33 = vld [vmem:[#allocation3 + $0x1c0] sm:$0xff]  ;;  %v1700_v63 = vld [vmem:[#allocation3 + $0x2f8] sm:$0xff] }
 0x477   :  { %v1695_v3 = vld [vmem:[#allocation3 + $0x2d0] sm:$0xff]  ;;  %1780 = vmatpush.msra.mxu3 %v1697_v26  ;;  %v1693_v8 = vld [vmem:[#allocation3 + $0x2c0] sm:$0xff]  ;;  %v1666_v26 = vld [vmem:[#allocation3 + $0x1e8] sm:$0xff] }
 0x478   :  { %v1631_v6 = vld [vmem:[#allocation3 + $0xd0] sm:$0xff]  ;;  %1740 = vmatpush.msrb.mxu1 %v1633_v2  ;;  %1761 = vmatpush.msrb.mxu2 %v1663_v1  ;;  %v1629_v9 = vld [vmem:[#allocation3 + $0xc0] sm:$0xff]  ;;  %v1636_v1 = vld [vmem:[#allocation3 + $0xf8] sm:$0xff] }
 0x479   :  { %1781 = vmatpush.msra.mxu3 %v1695_v3  ;;  %v1731_v23 = vld [vmem:[#allocation3 + $0x3f0] sm:$0xff]  ;;  %v1729_v12 = vld [vmem:[#allocation3 + $0x3e0] sm:$0xff]  ;;  %v1698_v2 = vld [vmem:[#allocation3 + $0x2e8] sm:$0xff] }
 0x47a   :  { %1741 = vmatpush.msrb.mxu1 %v1631_v6  ;;  %v1659_v11 = vld [vmem:[#allocation3 + $0x1b0] sm:$0xff]  ;;  %1799 = vmatpush.msra.mxu0 %v1731_v23  ;;  %v1657_v14 = vld [vmem:[#allocation3 + $0x1a0] sm:$0xff]  ;;  %v1664_v6 = vld [vmem:[#allocation3 + $0x1d8] sm:$0xff] }
 0x47b   :  { %v1691_v34 = vld [vmem:[#allocation3 + $0x2b0] sm:$0xff]  ;;  %1762 = vmatpush.msrb.mxu2 %v1661_v33  ;;  %1782 = vmatpush.msra.mxu3 %v1693_v8  ;;  %v1689_v18 = vld [vmem:[#allocation3 + $0x2a0] sm:$0xff]  ;;  %v1634_v33 = vld [vmem:[#allocation3 + $0xe8] sm:$0xff] }
 0x47c   :  { %v1627_v15 = vld [vmem:[#allocation3 + $0xb0] sm:$0xff]  ;;  %1742 = vmatpush.msrb.mxu1 %v1629_v9  ;;  %1800 = vmatpush.msra.mxu0 %v1729_v12  ;;  %v1625_v19 = vld [vmem:[#allocation3 + $0xa0] sm:$0xff]  ;;  %v1696_v8 = vld [vmem:[#allocation3 + $0x2d8] sm:$0xff] }
 0x47d   :  { %v1727_v5 = vld [vmem:[#allocation3 + $0x3d0] sm:$0xff]  ;;  %1763 = vmatpush.msrb.mxu2 %v1659_v11  ;;  %1783 = vmatpush.msra.mxu3 %v1691_v34  ;;  %v1725_v20 = vld [vmem:[#allocation3 + $0x3c0] sm:$0xff]  ;;  %v1662_v23 = vld [vmem:[#allocation3 + $0x1c8] sm:$0xff] }
 0x47e   :  { %1743 = vmatpush.msrb.mxu1 %v1627_v15  ;;  %v1655_v21 = vld [vmem:[#allocation3 + $0x190] sm:$0xff]  ;;  %1801 = vmatpush.msra.mxu0 %v1727_v5  ;;  %v1653_v28 = vld [vmem:[#allocation3 + $0x180] sm:$0xff]  ;;  %v1632_v11 = vld [vmem:[#allocation3 + $0xd8] sm:$0xff] }
 0x47f   :  { %v1687_v22 = vld [vmem:[#allocation3 + $0x290] sm:$0xff]  ;;  %1764 = vmatpush.msrb.mxu2 %v1657_v14  ;;  %1784 = vmatpush.msra.mxu3 %v1689_v18  ;;  %v1685_v29 = vld [vmem:[#allocation3 + $0x280] sm:$0xff]  ;;  %v1694_v34 = vld [vmem:[#allocation3 + $0x2c8] sm:$0xff] }
 0x480   :  { %v1623_v61 = vld [vmem:[#allocation3 + $0x90] sm:$0xff]  ;;  %1744 = vmatpush.msrb.mxu1 %v1625_v19  ;;  %1802 = vmatpush.msra.mxu0 %v1725_v20  ;;  %v1621_v30 = vld [vmem:[#allocation3 + $0x80] sm:$0xff]  ;;  %v1732_v12 = vld [vmem:[#allocation3 + $0x3f8] sm:$0xff] }
 0x481   :  { %v1723_v27 = vld [vmem:[#allocation3 + $0x3b0] sm:$0xff]  ;;  %1765 = vmatpush.msrb.mxu2 %v1655_v21  ;;  %1785 = vmatpush.msra.mxu3 %v1687_v22  ;;  %v1721_v35 = vld [vmem:[#allocation3 + $0x3a0] sm:$0xff]  ;;  %v1660_v15 = vld [vmem:[#allocation3 + $0x1b8] sm:$0xff] }
 0x482   :  { %1745 = vmatpush.msrb.mxu1 %v1623_v61  ;;  %v1651_v53 = vld [vmem:[#allocation3 + $0x170] sm:$0xff]  ;;  %1803 = vmatpush.msra.mxu0 %v1723_v27  ;;  %v1649_v10 = vld [vmem:[#allocation3 + $0x160] sm:$0xff]  ;;  %v1630_v5 = vld [vmem:[#allocation3 + $0xc8] sm:$0xff] }
 0x483   :  { %v1683_v43 = vld [vmem:[#allocation3 + $0x270] sm:$0xff]  ;;  %1766 = vmatpush.msrb.mxu2 %v1653_v28  ;;  %1786 = vmatpush.msra.mxu3 %v1685_v29  ;;  %v1681_v38 = vld [vmem:[#allocation3 + $0x260] sm:$0xff]  ;;  %v1692_v14 = vld [vmem:[#allocation3 + $0x2b8] sm:$0xff] }
 0x484   :  { %v1619_v31 = vld [vmem:[#allocation3 + $0x70] sm:$0xff]  ;;  %1746 = vmatpush.msrb.mxu1 %v1621_v30  ;;  %1804 = vmatpush.msra.mxu0 %v1721_v35  ;;  %v1617_v39 = vld [vmem:[#allocation3 + $0x60] sm:$0xff]  ;;  %v1730_v18 = vld [vmem:[#allocation3 + $0x3e8] sm:$0xff] }
 0x485   :  { %v1719_v32 = vld [vmem:[#allocation3 + $0x390] sm:$0xff]  ;;  %1767 = vmatpush.msrb.mxu2 %v1651_v53  ;;  %1787 = vmatpush.msra.mxu3 %v1683_v43  ;;  %v1717_v40 = vld [vmem:[#allocation3 + $0x380] sm:$0xff]  ;;  %v1658_v19 = vld [vmem:[#allocation3 + $0x1a8] sm:$0xff] }
 0x486   :  { %1747 = vmatpush.msrb.mxu1 %v1619_v31  ;;  %v1647_v24 = vld [vmem:[#allocation3 + $0x150] sm:$0xff]  ;;  %1805 = vmatpush.msra.mxu0 %v1719_v32  ;;  %v1645_v4 = vld [vmem:[#allocation3 + $0x140] sm:$0xff]  ;;  %v1628_v20 = vld [vmem:[#allocation3 + $0xb8] sm:$0xff] }
 0x487   :  { %v1679_v41 = vld [vmem:[#allocation3 + $0x250] sm:$0xff]  ;;  %1768 = vmatpush.msrb.mxu2 %v1649_v10  ;;  %1788 = vmatpush.msra.mxu3 %v1681_v38  ;;  %v1677_v25 = vld [vmem:[#allocation3 + $0x240] sm:$0xff]  ;;  %v1690_v21 = vld [vmem:[#allocation3 + $0x2a8] sm:$0xff] }
 0x488   :  { %v1615_v42 = vld [vmem:[#allocation3 + $0x50] sm:$0xff]  ;;  %1748 = vmatpush.msrb.mxu1 %v1617_v39  ;;  %1806 = vmatpush.msra.mxu0 %v1717_v40  ;;  %v1613_v7 = vld [vmem:[#allocation3 + $0x40] sm:$0xff]  ;;  %v1728_v22 = vld [vmem:[#allocation3 + $0x3d8] sm:$0xff] }
 0x489   :  { %v1715_v46 = vld [vmem:[#allocation3 + $0x370] sm:$0xff]  ;;  %1769 = vmatpush.msrb.mxu2 %v1647_v24  ;;  %1789 = vmatpush.msra.mxu3 %v1679_v41  ;;  %v1713_v36 = vld [vmem:[#allocation3 + $0x360] sm:$0xff]  ;;  %v1656_v61 = vld [vmem:[#allocation3 + $0x198] sm:$0xff] }
 0x48a   :  { %1749 = vmatpush.msrb.mxu1 %v1615_v42  ;;  %v1643_v45 = vld [vmem:[#allocation3 + $0x130] sm:$0xff]  ;;  %1807 = vmatpush.msra.mxu0 %v1715_v46  ;;  %v1641_v50 = vld [vmem:[#allocation3 + $0x120] sm:$0xff]  ;;  %v1626_v27 = vld [vmem:[#allocation3 + $0xa8] sm:$0xff] }
 0x48b   :  { %v1675_v47 = vld [vmem:[#allocation3 + $0x230] sm:$0xff]  ;;  %1770 = vmatpush.msrb.mxu2 %v1645_v4  ;;  %1790 = vmatpush.msra.mxu3 %v1677_v25  ;;  %v1673_v51 = vld [vmem:[#allocation3 + $0x220] sm:$0xff]  ;;  %v1688_v28 = vld [vmem:[#allocation3 + $0x298] sm:$0xff] }
 0x48c   :  { %v1611_v48 = vld [vmem:[#allocation3 + $0x30] sm:$0xff]  ;;  %1750 = vmatpush.msrb.mxu1 %v1613_v7  ;;  %1808 = vmatpush.msra.mxu0 %v1713_v36  ;;  %v1609_v52 = vld [vmem:[#allocation3 + $0x20] sm:$0xff]  ;;  %v1726_v29 = vld [vmem:[#allocation3 + $0x3c8] sm:$0xff] }
 0x48d   :  { %v1711_v49 = vld [vmem:[#allocation3 + $0x350] sm:$0xff]  ;;  %1771 = vmatpush.msrb.mxu2 %v1643_v45  ;;  %1791 = vmatpush.msra.mxu3 %v1675_v47  ;;  %v1709_v56 = vld [vmem:[#allocation3 + $0x340] sm:$0xff]  ;;  %v1654_v30 = vld [vmem:[#allocation3 + $0x188] sm:$0xff] }
 0x48e   :  { %1751 = vmatpush.msrb.mxu1 %v1611_v48  ;;  %v1639_v58 = vld [vmem:[#allocation3 + $0x110] sm:$0xff]  ;;  %1809 = vmatpush.msra.mxu0 %v1711_v49  ;;  %v1637_v60 = vld [vmem:[#allocation3 + $0x100] sm:$0xff]  ;;  %v1624_v35 = vld [vmem:[#allocation3 + $0x98] sm:$0xff] }
 0x48f   :  { %v1671_v57 = vld [vmem:[#allocation3 + $0x210] sm:$0xff]  ;;  %1772 = vmatpush.msrb.mxu2 %v1641_v50  ;;  %1792 = vmatpush.msra.mxu3 %v1673_v51  ;;  %v1669_v54 = vld [vmem:[#allocation3 + $0x200] sm:$0xff]  ;;  %v1686_v53 = vld [vmem:[#allocation3 + $0x288] sm:$0xff] }
 0x490   :  { %v1607_v59 = vld [vmem:[#allocation3 + $0x10] sm:$0xff]  ;;  %1752 = vmatpush.msrb.mxu1 %v1609_v52  ;;  %1810 = vmatpush.msra.mxu0 %v1709_v56  ;;  %v1605_v0 = vld [vmem:[#allocation3] sm:$0xff]  ;;  %v1724_v43 = vld [vmem:[#allocation3 + $0x3b8] sm:$0xff] }
 0x491   :  { %v1707_v55 = vld [vmem:[#allocation3 + $0x330] sm:$0xff]  ;;  %1773 = vmatpush.msrb.mxu2 %v1639_v58  ;;  %1793 = vmatpush.msra.mxu3 %v1671_v57  ;;  %v1705_v37 = vld [vmem:[#allocation3 + $0x320] sm:$0xff]  ;;  %v1652_v31 = vld [vmem:[#allocation3 + $0x178] sm:$0xff] }
 0x492   :  { %1753 = vmatpush.msrb.mxu1 %v1607_v59  ;;  %1811 = vmatpush.msra.mxu0 %v1707_v55  ;;  %v1703_v3 = vld [vmem:[#allocation3 + $0x310] sm:$0xff]  ;;  %v1701_v9 = vld [vmem:[#allocation3 + $0x300] sm:$0xff]  ;;  %v1622_v32 = vld [vmem:[#allocation3 + $0x88] sm:$0xff] }
 0x493   :  { %1774 = vmatpush.msrb.mxu2 %v1637_v60  ;;  %1794 = vmatpush.msra.mxu3 %v1669_v54  ;;  %v1684_v10 = vld [vmem:[#allocation3 + $0x278] sm:$0xff]  ;;  %v1722_v38 = vld [vmem:[#allocation3 + $0x3a8] sm:$0xff] }
 0x494   :  { %1754 = vmatpush.msrb.mxu1 %v1605_v0  ;;  %1812 = vmatpush.msra.mxu0 %v1705_v37  ;;  %v1650_v39 = vld [vmem:[#allocation3 + $0x168] sm:$0xff]  ;;  %v1620_v40 = vld [vmem:[#allocation3 + $0x78] sm:$0xff] }
 0x495   :  { %1839 = vmatpush.msra.mxu2 %v1668_v62  ;;  %1859 = vmatpush.msrb.mxu3 %v1700_v63  ;;  %v1682_v24 = vld [vmem:[#allocation3 + $0x268] sm:$0xff]  ;;  %v1648_v41 = vld [vmem:[#allocation3 + $0x158] sm:$0xff] }
 0x496   :  { %1819 = vmatpush.msra.mxu1 %v1636_v1  ;;  %1813 = vmatpush.msra.mxu0 %v1703_v3  ;;  %v1618_v42 = vld [vmem:[#allocation3 + $0x68] sm:$0xff]  ;;  %v1680_v46 = vld [vmem:[#allocation3 + $0x258] sm:$0xff]  ;;  %v1921_v1 = vld [vmem:[%s2972_s10 + $0x78] sm:$0xff] }
 0x497   :  { %1840 = vmatpush.msra.mxu2 %v1666_v26  ;;  %1860 = vmatpush.msrb.mxu3 %v1698_v2  ;;  %v1720_v4 = vld [vmem:[#allocation3 + $0x398] sm:$0xff]  ;;  %v1646_v25 = vld [vmem:[#allocation3 + $0x148] sm:$0xff]  ;;  %v1937_v2 = vld [vmem:[%s2972_s10 + $0xf8] sm:$0xff] }
 0x498   :  { %1820 = vmatpush.msra.mxu1 %v1634_v33  ;;  %1814 = vmatpush.msra.mxu0 %v1701_v9  ;;  %v1616_v7 = vld [vmem:[#allocation3 + $0x58] sm:$0xff]  ;;  %v1678_v36 = vld [vmem:[#allocation3 + $0x248] sm:$0xff] }
 0x499   :  { %1841 = vmatpush.msra.mxu2 %v1664_v6  ;;  %1861 = vmatpush.msrb.mxu3 %v1696_v8  ;;  %v1644_v45 = vld [vmem:[#allocation3 + $0x138] sm:$0xff]  ;;  %v1718_v47 = vld [vmem:[#allocation3 + $0x388] sm:$0xff] }
 0x49a   :  { %1821 = vmatpush.msra.mxu1 %v1632_v11  ;;  %1879 = vmatpush.msrb.mxu0 %v1732_v12  ;;  %v1676_v48 = vld [vmem:[#allocation3 + $0x238] sm:$0xff]  ;;  %v1614_v49 = vld [vmem:[#allocation3 + $0x48] sm:$0xff]  ;;  %v1917_v11 = vld [vmem:[%s2972_s10 + $0x58] sm:$0xff] }
 0x49b   :  { %1842 = vmatpush.msra.mxu2 %v1662_v23  ;;  %1862 = vmatpush.msrb.mxu3 %v1694_v34  ;;  %v1642_v50 = vld [vmem:[#allocation3 + $0x128] sm:$0xff]  ;;  %v1716_v51 = vld [vmem:[#allocation3 + $0x378] sm:$0xff]  ;;  %v1933_v34 = vld [vmem:[%s2972_s10 + $0xd8] sm:$0xff] }
 0x49c   :  { %1822 = vmatpush.msra.mxu1 %v1630_v5  ;;  %1880 = vmatpush.msrb.mxu0 %v1730_v18  ;;  %v1674_v52 = vld [vmem:[#allocation3 + $0x228] sm:$0xff]  ;;  %v1612_v56 = vld [vmem:[#allocation3 + $0x38] sm:$0xff]  ;;  %v1913_v5 = vld [vmem:[%s2972_s10 + $0x38] sm:$0xff] }
 0x49d   :  { %1843 = vmatpush.msra.mxu2 %v1660_v15  ;;  %1863 = vmatpush.msrb.mxu3 %v1692_v14  ;;  %v1640_v58 = vld [vmem:[#allocation3 + $0x118] sm:$0xff]  ;;  %v1714_v57 = vld [vmem:[#allocation3 + $0x368] sm:$0xff]  ;;  %v1915_v15 = vld [vmem:[%s2972_s10 + $0x48] sm:$0xff] }
 0x49e   :  { %1823 = vmatpush.msra.mxu1 %v1628_v20  ;;  %1881 = vmatpush.msrb.mxu0 %v1728_v22  ;;  %v1672_v59 = vld [vmem:[#allocation3 + $0x218] sm:$0xff]  ;;  %v1610_v55 = vld [vmem:[#allocation3 + $0x28] sm:$0xff]  ;;  %v1911_v18 = vld [vmem:[%s2972_s10 + $0x28] sm:$0xff] }
 0x49f   :  { %1844 = vmatpush.msra.mxu2 %v1658_v19  ;;  %1864 = vmatpush.msrb.mxu3 %v1690_v21  ;;  %v1638_v60 = vld [vmem:[#allocation3 + $0x108] sm:$0xff]  ;;  %v1712_v54 = vld [vmem:[#allocation3 + $0x358] sm:$0xff]  ;;  %v1931_v21 = vld [vmem:[%s2972_s10 + $0xc8] sm:$0xff] }
 0x4a0   :  { %1824 = vmatpush.msra.mxu1 %v1626_v27  ;;  %1882 = vmatpush.msrb.mxu0 %v1726_v29  ;;  %v1608_v62 = vld [vmem:[#allocation3 + $0x18] sm:$0xff]  ;;  %v1670_v63 = vld [vmem:[#allocation3 + $0x208] sm:$0xff]  ;;  %v1909_v22 = vld [vmem:[%s2972_s10 + $0x18] sm:$0xff] }
 0x4a1   :  { %1845 = vmatpush.msra.mxu2 %v1656_v61  ;;  %1865 = vmatpush.msrb.mxu3 %v1688_v28  ;;  %v1710_v0 = vld [vmem:[#allocation3 + $0x348] sm:$0xff]  ;;  %v1708_v26 = vld [vmem:[#allocation3 + $0x338] sm:$0xff]  ;;  %v1929_v28 = vld [vmem:[%s2972_s10 + $0xb8] sm:$0xff] }
 0x4a2   :  { %1825 = vmatpush.msra.mxu1 %v1624_v35  ;;  %1883 = vmatpush.msrb.mxu0 %v1724_v43  ;;  %v1606_v37 = vld [vmem:[#allocation3 + $0x8] sm:$0xff]  ;;  %v1704_v33 = vld [vmem:[#allocation3 + $0x318] sm:$0xff]  ;;  %v1907_v29 = vld [vmem:[%s2972_s10 + $0x8] sm:$0xff] }
 0x4a3   :  { %1846 = vmatpush.msra.mxu2 %v1654_v30  ;;  %1866 = vmatpush.msrb.mxu3 %v1686_v53  ;;  %v1706_v3 = vld [vmem:[#allocation3 + $0x328] sm:$0xff]  ;;  %v1918_v9 = vld [vmem:[%s2972_s10 + $0x60] sm:$0xff]  ;;  %v1927_v53 = vld [vmem:[%s2972_s10 + $0xa8] sm:$0xff] }
 0x4a4   :  { %1826 = vmatpush.msra.mxu1 %v1622_v32  ;;  %1884 = vmatpush.msrb.mxu0 %v1722_v38  ;;  %v1936_v6 = vld [vmem:[%s2972_s10 + $0xf0] sm:$0xff]  ;;  %v1934_v23 = vld [vmem:[%s2972_s10 + $0xe0] sm:$0xff] }
 0x4a5   :  { %1847 = vmatpush.msra.mxu2 %v1652_v31  ;;  %1867 = vmatpush.msrb.mxu3 %v1684_v10  ;;  %v1702_v8 = vld [vmem:[#allocation3 + $0x308] sm:$0xff]  ;;  %v1910_v20 = vld [vmem:[%s2972_s10 + $0x20] sm:$0xff]  ;;  %v1925_v31 = vld [vmem:[%s2972_s10 + $0x98] sm:$0xff] }
 0x4a6   :  { %1827 = vmatpush.msra.mxu1 %v1620_v40  ;;  %1775 = vmatmul.f32.vlgmr.msrb.gmra.mxu2 %v2790_v16  ;;  %v1916_v12 = vld [vmem:[%s2972_s10 + $0x50] sm:$0xff]  ;;  %v1930_v61 = vld [vmem:[%s2972_s10 + $0xc0] sm:$0xff]  ;;  %v1923_v10 = vld [vmem:[%s2972_s10 + $0x88] sm:$0xff] }
 0x4a7   :  { %1848 = vmatpush.msra.mxu2 %v1650_v39  ;;  %1868 = vmatpush.msrb.mxu3 %v1682_v24  ;;  %v1912_v14 = vld [vmem:[%s2972_s10 + $0x30] sm:$0xff]  ;;  %v1906_v35 = vld [vmem:[%s2972_s10] sm:$0xff]  ;;  %v2001_v39 = vld [vmem:[%s2974_s12 + $0x78] sm:$0xff] }
 0x4a8   :  { %1828 = vmatpush.msra.mxu1 %v1618_v42  ;;  %1885 = vmatpush.msrb.mxu0 %v1720_v4  ;;  %v1932_v19 = vld [vmem:[%s2972_s10 + $0xd0] sm:$0xff]  ;;  %v1926_v43 = vld [vmem:[%s2972_s10 + $0xa0] sm:$0xff]  ;;  %v1999_v24 = vld [vmem:[%s2974_s12 + $0x68] sm:$0xff] }
 0x4a9   :  { %1849 = vmatpush.msra.mxu2 %v1648_v41  ;;  %1869 = vmatpush.msrb.mxu3 %v1680_v46  ;;  %v1908_v27 = vld [vmem:[%s2972_s10 + $0x10] sm:$0xff]  ;;  %v1922_v38 = vld [vmem:[%s2972_s10 + $0x80] sm:$0xff]  ;;  %v1997_v4 = vld [vmem:[%s2974_s12 + $0x58] sm:$0xff] }
 0x4aa   :  { %1795 = vmatmul.f32.vlgmr.msra.gmra.mxu3 %v2792_v44  ;;  %1829 = vmatpush.msra.mxu1 %v1616_v7  ;;  %v1928_v30 = vld [vmem:[%s2972_s10 + $0xb0] sm:$0xff]  ;;  %v1733_v41 = vld [vmem:[%s2971_s9] sm:$0x3]  ;;  %s2237_s9 = smov [#allocation9]  }
 0x4ab   :  { %1850 = vmatpush.msra.mxu2 %v1646_v25  ;;  %1870 = vmatpush.msrb.mxu3 %v1678_v36  ;;  %v1924_v32 = vld [vmem:[%s2972_s10 + $0x90] sm:$0xff]  ;;  %v1998_v42 = vld [vmem:[%s2974_s12 + $0x60] sm:$0xff]  ;;  %v1735_v46 = vperm.slane %v1733_v41, 0 }
 0x4ac   :  { %1886 = vmatpush.msrb.mxu0 %v1718_v47  ;;  %1755 = vmatmul.f32.vlgmr.msrb.gmra.mxu1 %v2788_v13  ;;  %v2000_v40 = vld [vmem:[%s2974_s12 + $0x70] sm:$0xff] }
 0x4ad   :  { %1851 = vmatpush.msra.mxu2 %v1644_v45  ;;  %1871 = vmatpush.msrb.mxu3 %v1676_v48 }
 0x4ae   :  { %1830 = vmatpush.msra.mxu1 %v1614_v49  ;;  %1887 = vmatpush.msrb.mxu0 %v1716_v51  ;;  %v1736_v51 = vperm.slane %v1733_v41, 1 }
 0x4af   :  { %1852 = vmatpush.msra.mxu2 %v1642_v50  ;;  %1872 = vmatpush.msrb.mxu3 %v1674_v52  ;;  %v1901_v50 = vstv %s2324_s22 }
 0x4b0   :  { %1831 = vmatpush.msra.mxu1 %v1612_v56  ;;  %1888 = vmatpush.msrb.mxu0 %v1714_v57 }
 0x4b1   :  { %1853 = vmatpush.msra.mxu2 %v1640_v58  ;;  %1873 = vmatpush.msrb.mxu3 %v1672_v59 }
 0x4b2   :  { %1832 = vmatpush.msra.mxu1 %v1610_v55  ;;  %1889 = vmatpush.msrb.mxu0 %v1712_v54 }
 0x4b3   :  { %1854 = vmatpush.msra.mxu2 %v1638_v60  ;;  %1815 = vmatmul.f32.vlgmr.msra.gmra.mxu0 %v2794_v17 }
 0x4b4   :  { %1855 = vmatmul.f32.vlgmr.msra.gmra.mxu2 %v2790_v16  ;;  %1833 = vmatpush.msra.mxu1 %v1608_v62  ;;  %v1920_v16 = vld [vmem:[%s2972_s10 + $0x70] sm:$0xff] }
 0x4b5   :  { %1874 = vmatpush.msrb.mxu3 %v1670_v63  ;;  %1890 = vmatpush.msrb.mxu0 %v1710_v0 }
 0x4b6   :  { %1875 = vmatmul.f32.vlgmr.msrb.gmra.mxu3 %v2792_v44  ;;  %1834 = vmatpush.msra.mxu1 %v1606_v37  ;;  %v1919_v44 = vld [vmem:[%s2972_s10 + $0x68] sm:$0xff] }
 0x4b7   :  { %1891 = vmatpush.msrb.mxu0 %v1708_v26  ;;  %1835 = vmatmul.f32.vlgmr.msra.gmra.mxu1 %v2788_v13  ;;  %v1935_v13 = vld [vmem:[%s2972_s10 + $0xe8] sm:$0xff] }
 0x4b8   :  { %1942 = vmatpush.msrb.mxu1 %v1921_v1  ;;  %1962 = vmatpush.msrb.mxu2 %v1937_v2  ;;  %v1996_v1 = vld [vmem:[%s2974_s12 + $0x50] sm:$0xff]  ;;  %v1995_v2 = vld [vmem:[%s2974_s12 + $0x48] sm:$0xff] }
 0x4b9   :  { %1892 = vmatpush.msrb.mxu0 %v1706_v3  ;;  %2006 = vmatpush.msra.mxu3 %v2001_v39  ;;  %v1994_v3 = vld [vmem:[%s2974_s12 + $0x40] sm:$0xff] }
 0x4ba   :  { %1943 = vmatpush.msrb.mxu1 %v1920_v16  ;;  %1963 = vmatpush.msrb.mxu2 %v1936_v6  ;;  %v1993_v16 = vld [vmem:[%s2974_s12 + $0x38] sm:$0xff]  ;;  %v1992_v6 = vld [vmem:[%s2974_s12 + $0x30] sm:$0xff] }
 0x4bb   :  { %1893 = vmatpush.msrb.mxu0 %v1704_v33  ;;  %2007 = vmatpush.msra.mxu3 %v2000_v40  ;;  %v1991_v33 = vld [vmem:[%s2974_s12 + $0x28] sm:$0xff] }
 0x4bc   :  { %1944 = vmatpush.msrb.mxu1 %v1919_v44  ;;  %1964 = vmatpush.msrb.mxu2 %v1935_v13  ;;  %v1990_v44 = vld [vmem:[%s2974_s12 + $0x20] sm:$0xff]  ;;  %v1989_v13 = vld [vmem:[%s2974_s12 + $0x18] sm:$0xff] }
 0x4bd   :  { %1894 = vmatpush.msrb.mxu0 %v1702_v8  ;;  %2008 = vmatpush.msra.mxu3 %v1999_v24  ;;  %v1988_v8 = vld [vmem:[%s2974_s12 + $0x10] sm:$0xff] }
 0x4be   :  { %1895 = vmatmul.f32.vlgmr.msrb.gmra.mxu0 %v2794_v17  ;;  %1945 = vmatpush.msrb.mxu1 %v1918_v9  ;;  %v1914_v17 = vld [vmem:[%s2972_s10 + $0x40] sm:$0xff]  ;;  %v1987_v9 = vld [vmem:[%s2974_s12 + $0x8] sm:$0xff] }
 0x4bf   :  { %1965 = vmatpush.msrb.mxu2 %v1934_v23  ;;  %2009 = vmatpush.msra.mxu3 %v1998_v42  ;;  %v1986_v23 = vld [vmem:[%s2974_s12] sm:$0xff]  ;;  %s2033_s12 = sshll.u32 %s2237_s9, 4  ;;  %s2034_s12 = int_to_ptr.vmem [resolvable:$true] %s2033_s12 }
 0x4c0   :  { %1946 = vmatpush.msrb.mxu1 %v1917_v11  ;;  %v2138_v11 = vld [vmem:[%s2973_s11] ss:$0 sm:$0xff] }
 0x4c1   :  { %1966 = vmatpush.msrb.mxu2 %v1933_v34  ;;  %2010 = vmatpush.msra.mxu3 %v1997_v4 }
 0x4c2   :  { %1947 = vmatpush.msrb.mxu1 %v1916_v12 }
 0x4c3   :  { %1967 = vmatpush.msrb.mxu2 %v1932_v19  ;;  %2011 = vmatpush.msra.mxu3 %v1996_v1  ;;  %v2139_v19 = vld [vmem:[%s2975_s13] ss:$0 sm:$0xff] }
 0x4c4   :  { %1948 = vmatpush.msrb.mxu1 %v1915_v15 }
 0x4c5   :  { %1968 = vmatpush.msrb.mxu2 %v1931_v21  ;;  %2012 = vmatpush.msra.mxu3 %v1995_v2 }
 0x4c6   :  { %1949 = vmatpush.msrb.mxu1 %v1914_v17  ;;  %v1983_v17 = vstv %s2326_s0 }
 0x4c7   :  { %1969 = vmatpush.msrb.mxu2 %v1930_v61  ;;  %2013 = vmatpush.msra.mxu3 %v1994_v3 }
 0x4c8   :  { %1950 = vmatpush.msrb.mxu1 %v1913_v5 }
 0x4c9   :  { %1970 = vmatpush.msrb.mxu2 %v1929_v28  ;;  %2014 = vmatpush.msra.mxu3 %v1993_v16 }
 0x4ca   :  { %1951 = vmatpush.msrb.mxu1 %v1912_v14 }
 0x4cb   :  { %1971 = vmatpush.msrb.mxu2 %v1928_v30  ;;  %2015 = vmatpush.msra.mxu3 %v1992_v6 }
 0x4cc   :  { %1952 = vmatpush.msrb.mxu1 %v1911_v18 }
 0x4cd   :  { %1972 = vmatpush.msrb.mxu2 %v1927_v53  ;;  %2016 = vmatpush.msra.mxu3 %v1991_v33 }
 0x4ce   :  { %1953 = vmatpush.msrb.mxu1 %v1910_v20 }
 0x4cf   :  { %1973 = vmatpush.msrb.mxu2 %v1926_v43  ;;  %2017 = vmatpush.msra.mxu3 %v1990_v44 }
 0x4d0   :  { %1954 = vmatpush.msrb.mxu1 %v1909_v22 }
 0x4d1   :  { %1974 = vmatpush.msrb.mxu2 %v1925_v31  ;;  %2018 = vmatpush.msra.mxu3 %v1989_v13 }
 0x4d2   :  { %1955 = vmatpush.msrb.mxu1 %v1908_v27 }
 0x4d3   :  { %1975 = vmatpush.msrb.mxu2 %v1924_v32  ;;  %2019 = vmatpush.msra.mxu3 %v1988_v8 }
 0x4d4   :  { %1956 = vmatpush.msrb.mxu1 %v1907_v29 }
 0x4d5   :  { %1976 = vmatpush.msrb.mxu2 %v1923_v10  ;;  %2020 = vmatpush.msra.mxu3 %v1987_v9 }
 0x4d6   :  { %1957 = vmatpush.msrb.mxu1 %v1906_v35 }
 0x4d7   :  { %1977 = vmatpush.msrb.mxu2 %v1922_v38  ;;  %2021 = vmatpush.msra.mxu3 %v1986_v23 }
 0x529   :  { %v1756_v25 = vpop.f32.mrf.mxu1  ;;  %v1776_v7 = vpop.f32.mrf.mxu2 }
 0x52a   :  { %v1757_v36 = vadd.f32 %v1756_v25, %v1735_v46 }
 0x52c   :  { %v1777_v45 = vadd.f32 %v1776_v7, %v1757_v36 }
 0x52d   :  { %v1796_v47 = vpop.f32.mrf.mxu3 }
 0x52e   :  { %v1797_v48 = vadd.f32 %v1796_v47, %v1777_v45 }
 0x530   :  { %v1816_v49 = vpop.f32.mrf.mxu0 }
 0x531   :  { %v1817_v52 = vadd.f32 %v1816_v49, %v1797_v48 }
 0x533   :  { %vm1899_vm4 = vcmp.ge.f32.partialorder %v1817_v52, 0.0  ;;  %v1902_v56 = vmul.f32 %v1901_v50, %v1817_v52 }
 0x534   :  { %v1836_v58 = vpop.f32.mrf.mxu1 }
 0x535   :  { %v1837_v57 = vadd.f32 %v1836_v58, %v1736_v51  ;;  %v1904_v55 = vsel %vm1899_vm4, %v1817_v52, %v1902_v56 }
 0x536   :  { %1958 = vmatmul.f32.vlgmr.msrb.gmra.mxu1 %v1904_v55 }
 0x537   :  { %v1856_v59 = vpop.f32.mrf.mxu2 }
 0x538   :  { %v1857_v60 = vadd.f32 %v1856_v59, %v1837_v57 }
 0x539   :  { %v1876_v54 = vpop.f32.mrf.mxu3 }
 0x53a   :  { %v1877_v62 = vadd.f32 %v1876_v54, %v1857_v60 }
 0x53b   :  { %v1896_v63 = vpop.f32.mrf.mxu0 }
 0x53c   :  { %v1897_v0 = vadd.f32 %v1896_v63, %v1877_v62 }
 0x53e   :  { %vm1900_vm5 = vcmp.ge.f32.partialorder %v1897_v0, 0.0  ;;  %v1903_v37 = vmul.f32 %v1901_v50, %v1897_v0 }
 0x540   :  { %v1905_v26 = vsel %vm1900_vm5, %v1897_v0, %v1903_v37 }
 0x541   :  { %1978 = vmatmul.f32.vlgmr.msrb.gmra.mxu2 %v1905_v26 }
 0x5b3   :  { %v1959_v34 = vpop.f32.mrf.mxu1 }
 0x5b4   :  { %v1960_v12 = vadd.f32 %v2138_v11, %v1959_v34 }
 0x5c4   :  { %v1979_v15 = vpop.f32.mrf.mxu2 }
 0x5c5   :  { %v1980_v5 = vadd.f32 %v1979_v15, %v1960_v12 }
 0x5c7   :  { %vm1982_vm6 = vcmp.ge.f32.partialorder %v1980_v5, 0.0  ;;  %v1984_v14 = vmul.f32 %v1983_v17, %v1980_v5 }
 0x5c9   :  { %v1985_v18 = vsel %vm1982_vm6, %v1980_v5, %v1984_v14 }
 0x5ca   :  { %2022 = vmatmul.f32.vlgmr.msra.gmra.mxu3 %v1985_v18 }
 0x64d   :  { %v2023_v20 = vpop.f32.mrf.mxu3 }
 0x64e   :  { %v2024_v21 = vadd.f32 %v2139_v19, %v2023_v20 }
 0x650   :  { %2027 = vst.msk [vmem:[#allocation9] sm:$0x3] %vm2026_vm7, %v2024_v21 }
 0x651   :  { %2038 = dma.vmem_to_hbm [thread:$0]  %s2034_s12, 32, %s2036_s20, [#allocation7]  }
 0x652   :  { %2230 = dma.done.wait [#allocation7], 32  }
 0x653   :  { %2231 = vsyncadd [#allocation7], 4294967264 }
 0x654   :  { %2043 = vsyncpa [#allocation7], 1 }
 0x655   :  { %2044 = vsyncpa [#allocation8], 1 }
 0x656   :  { %2045 = vsyncmov [#allocation4] }
 0x659   :  { %s2046_s11 = vpop.sfrf %2045 }
 0x65a   :  { %p2128_p0 = scmp.ne.s32.totalorder %s2046_s11, 0 }
 0x65c   :  { %2050 = shalt.err (%p2128_p0)  }
 0x65d   :  { %2052 = vsyncmov [#allocation4 + $0x1] }
 0x660   :  { %s2053_s13 = vpop.sfrf %2052 }
 0x661   :  { %p2129_p1 = scmp.ne.s32.totalorder %s2053_s13, 0 }
 0x663   :  { %2057 = shalt.err (%p2129_p1)  }

</bundles_post_ra>
